<compile_context>
chip_gen: v7x
topology: tpu7x:2x2x1
jax: 0.10.0
libtpu: 0.0.40
codegen_flags: <defaults>
</compile_context>

<pallas_src>
import functools

import jax
import jax.numpy as jnp
from jax import lax
from jax.experimental import pallas as pl
from jax.experimental.pallas import tpu as pltpu


# ----------------------------------------------------------------------------
# Kernel A: 3x3 conv (stride 1) on one (batch, H-tile) block + BN partial stats
# ----------------------------------------------------------------------------
def conv_stats_kernel(xpad_ref, w_ref, y_ref, stats_ref):
    """xpad_ref : (Hp, Wp, Cin)    bf16  full padded image of this batch element
       w_ref    : (9*Cin, Cout)    bf16  im2col-packed conv weight
       y_ref    : (tileH, W, Cout) f32   conv output tile
       stats_ref: (1, 1, 2, Cout)  f32   [sum, sum_of_squares] of this tile
    """
    tile_h, W, Cout = y_ref.shape
    Cin = xpad_ref.shape[-1]
    row0 = pl.multiple_of(pl.program_id(1) * tile_h, tile_h)

    # im2col: 9 shifted (tileH*W, Cin) slabs concatenated to K = 9*Cin (single MXU matmul).
    cols = []
    for ky in range(3):
        for kx in range(3):
            patch = xpad_ref[pl.ds(row0 + ky, tile_h), kx:kx + W, :]   # (tileH, W, Cin) bf16
            cols.append(patch.reshape(tile_h * W, Cin))
    patches = jnp.concatenate(cols, axis=-1)                            # (tileH*W, 9*Cin) bf16

    acc = jnp.dot(patches, w_ref[...],
                  preferred_element_type=jnp.float32)                   # (tileH*W, Cout) f32
    y_ref[...] = acc.reshape(tile_h, W, Cout)

    # Per-tile partial BatchNorm statistics (reduced across the grid in the wrapper).
    ssum = jnp.sum(acc, axis=0, keepdims=True)                          # (1, Cout)
    ssq = jnp.sum(acc * acc, axis=0, keepdims=True)                     # (1, Cout)
    stats_ref[...] = jnp.concatenate([ssum, ssq], axis=0).reshape(1, 1, 2, Cout)


# ----------------------------------------------------------------------------
# Kernel B: folded BatchNorm (one FMA) + ReLU (+ optional residual add)
# ----------------------------------------------------------------------------
def bn_relu_kernel(y_ref, scale_ref, shift_ref, o_ref):
    y = y_ref[...] * scale_ref[...] + shift_ref[...]
    o_ref[...] = jnp.maximum(y, 0.0)


def bn_relu_residual_kernel(y_ref, scale_ref, shift_ref, x_ref, o_ref):
    y = y_ref[...] * scale_ref[...] + shift_ref[...]
    o_ref[...] = x_ref[...] + jnp.maximum(y, 0.0)


# ----------------------------------------------------------------------------
# Wrapper
# ----------------------------------------------------------------------------
def _pick_tile_h(h, target=8):
    t = min(target, h)
    while h % t:
        t -= 1
    return t


def init_params(key, in_channels, out_channels):
    k1, k2, k3, k4 = jax.random.split(key, 4)
    return dict(
        conv_w=0.1 * jax.random.normal(k1, (out_channels, in_channels, 3, 3), jnp.float32),
        # Kept for torch parity only: NOT fed to the kernel because training-mode
        # BatchNorm's mean subtraction cancels a per-channel constant exactly.
        conv_b=0.1 * jax.random.normal(k2, (out_channels,), jnp.float32),
        gamma=1.0 + 0.1 * jax.random.normal(k3, (out_channels,), jnp.float32),
        beta=0.1 * jax.random.normal(k4, (out_channels,), jnp.float32),
    )


@functools.partial(jax.jit, static_argnames=("residual",))
def double_conv_forward(x_nchw, params, residual=False):
    x = jnp.transpose(x_nchw, (0, 2, 3, 1)).astype(jnp.float32)        # NHWC
    N, H, W, Cin = x.shape
    Cout = params["conv_w"].shape[0]

    tile_h = _pick_tile_h(H)
    HT = H // tile_h

    # TODO(synk): fuse the zero-pad (and NCHW->NHWC transpose) into the kernel's index_map/masking
    # to save one HBM round trip of the activation.
    xpad = jnp.pad(x, ((0, 0), (1, 1), (1, 1), (0, 0))).astype(jnp.bfloat16)
    Hp, Wp = H + 2, W + 2

    # (Cout, Cin, 3, 3) -> (3, 3, Cin, Cout) -> (9*Cin, Cout), bf16 for the MXU.
    w9 = jnp.transpose(params["conv_w"], (2, 3, 1, 0)).reshape(9 * Cin, Cout).astype(jnp.bfloat16)

    conv_out, stats = pl.pallas_call(
        conv_stats_kernel,
        grid=(N, HT),
        in_specs=[
            pl.BlockSpec((None, Hp, Wp, Cin), lambda n, h: (n, 0, 0, 0)),   # fetched once per n
            pl.BlockSpec((9 * Cin, Cout), lambda n, h: (0, 0)),
        ],
        out_specs=(
            pl.BlockSpec((None, tile_h, W, Cout), lambda n, h: (n, h, 0, 0)),
            pl.BlockSpec((1, 1, 2, Cout), lambda n, h: (n, h, 0, 0)),
        ),
        out_shape=(
            jax.ShapeDtypeStruct((N, H, W, Cout), jnp.float32),
            jax.ShapeDtypeStruct((N, HT, 2, Cout), jnp.float32),
        ),
        compiler_params=pltpu.CompilerParams(
            dimension_semantics=("parallel", "parallel")),
    )(xpad, w9)

    # Fold training-mode BatchNorm into one per-channel scale/shift (tiny (Cout,) math).
    count = jnp.float32(N * H * W)
    total = jnp.sum(stats, axis=(0, 1))                                 # (2, Cout)
    mean = total[0] / count
    var = total[1] / count - mean * mean
    scale = params["gamma"] * lax.rsqrt(var + 1e-5)
    shift = params["beta"] - mean * scale
    scale = scale.reshape(1, Cout).astype(jnp.float32)
    shift = shift.reshape(1, Cout).astype(jnp.float32)

    tile_spec = pl.BlockSpec((None, tile_h, W, Cout), lambda n, h: (n, h, 0, 0))
    vec_spec = pl.BlockSpec((1, Cout), lambda n, h: (0, 0))
    cparams = pltpu.CompilerParams(dimension_semantics=("parallel", "parallel"))
    out_shape = jax.ShapeDtypeStruct((N, H, W, Cout), jnp.float32)

    if residual:
        assert Cin == Cout, "residual DoubleConv requires in_channels == out_channels"
        out_nhwc = pl.pallas_call(
            bn_relu_residual_kernel,
            grid=(N, HT),
            in_specs=[tile_spec, vec_spec, vec_spec, tile_spec],
            out_specs=tile_spec,
            out_shape=out_shape,
            compiler_params=cparams,
        )(conv_out, scale, shift, x)
    else:
        out_nhwc = pl.pallas_call(
            bn_relu_kernel,
            grid=(N, HT),
            in_specs=[tile_spec, vec_spec, vec_spec],
            out_specs=tile_spec,
            out_shape=out_shape,
            compiler_params=cparams,
        )(conv_out, scale, shift)

    return jnp.transpose(out_nhwc, (0, 3, 1, 2))                        # back to NCHW


# ----------------------------------------------------------------------------
# Pure-JAX reference (conv in bf16 operands / f32 accumulation, like the kernel)
# ----------------------------------------------------------------------------
def double_conv_reference(x_nchw, params, residual=False):
    x = jnp.transpose(x_nchw, (0, 2, 3, 1)).astype(jnp.float32)
    w_hwio = jnp.transpose(params["conv_w"], (2, 3, 1, 0))
    y = lax.conv_general_dilated(
        x.astype(jnp.bfloat16), w_hwio.astype(jnp.bfloat16),
        window_strides=(1, 1), padding="SAME",
        dimension_numbers=("NHWC", "HWIO", "NHWC"),
        preferred_element_type=jnp.float32)
    y = y + params["conv_b"]          # cancelled by BN below (kernel drops it)
    mean = jnp.mean(y, axis=(0, 1, 2), keepdims=True)
    var = jnp.mean(jnp.square(y - mean), axis=(0, 1, 2), keepdims=True)
    y = (y - mean) * lax.rsqrt(var + 1e-5) * params["gamma"] + params["beta"]
    y = jnp.maximum(y, 0.0)
    if residual:
        y = x + y
    return jnp.transpose(y, (0, 3, 1, 2))


if __name__ == "__main__":
    key = jax.random.PRNGKey(0)

    # Case 1: plain DoubleConv(32 -> 128); Cout=128 keeps the output stores lane-dense.
    k1, k2, key = jax.random.split(key, 3)
    N, Cin, H, W, Cout = 2, 32, 16, 16, 128
    x1 = jax.random.normal(k1, (N, Cin, H, W), jnp.float32)
    p1 = init_params(k2, Cin, Cout)
    out1 = jax.block_until_ready(double_conv_forward(x1, p1, residual=False))
    ref1 = double_conv_reference(x1, p1, residual=False)
    assert out1.shape == (N, Cout, H, W), out1.shape
    err1 = float(jnp.max(jnp.abs(out1 - ref1)))
    assert err1 < 5e-3, f"case1 max err {err1}"

    # Case 2: residual DoubleConv(64 -> 64).
    k1, k2, key = jax.random.split(key, 3)
    N, C, H, W = 2, 64, 16, 16
    x2 = jax.random.normal(k1, (N, C, H, W), jnp.float32)
    p2 = init_params(k2, C, C)
    out2 = jax.block_until_ready(double_conv_forward(x2, p2, residual=True))
    ref2 = double_conv_reference(x2, p2, residual=True)
    assert out2.shape == (N, C, H, W), out2.shape
    err2 = float(jnp.max(jnp.abs(out2 - ref2)))
    assert err2 < 5e-3, f"case2 max err {err2}"

    print("KERNEL_OK")
</pallas_src>

<mosaic_0001>
module attributes {stable_mosaic.version = 11 : i64} {
  func.func @conv_stats_kernel(%arg0: i32, %arg1: i32, %arg2: memref<1x18x18x32xbf16, #tpu.memory_space<vmem>>, %arg3: memref<288x128xbf16, #tpu.memory_space<vmem>>, %arg4: memref<1x8x16x128xf32, #tpu.memory_space<vmem>>, %arg5: memref<1x1x2x128xf32, #tpu.memory_space<vmem>>) attributes {dimension_semantics = [#tpu.dimension_semantics<parallel>, #tpu.dimension_semantics<parallel>], iteration_bounds = array<i64: 2, 2>, scalar_prefetch = 0 : i64, scratch_operands = 0 : i64, tpu.core_type = #tpu.core_type<tc>, window_params = [{transform_indices = @transform_0, window_bounds = array<i64: 1, 18, 18, 32>}, {pipeline_mode = #tpu.pipeline_mode<synchronous>, transform_indices = @transform_1, window_bounds = array<i64: 288, 128>}, {transform_indices = @transform_2, window_bounds = array<i64: 1, 8, 16, 128>}, {transform_indices = @transform_3, window_bounds = array<i64: 1, 1, 2, 128>}]} {
    %c8_i32 = arith.constant 8 : i32
    %0 = arith.muli %arg1, %c8_i32 : i32
    %1 = tpu.assume_multiple %0, 8 : i32
    %c0_i32 = arith.constant 0 : i32
    %2 = arith.addi %1, %c0_i32 : i32
    %c0 = arith.constant 0 : index
    %3 = arith.index_cast %2 : i32 to index
    %c0_0 = arith.constant 0 : index
    %c0_1 = arith.constant 0 : index
    %4 = vector.load %arg2[%c0, %3, %c0_0, %c0_1] : memref<1x18x18x32xbf16, #tpu.memory_space<vmem>>, vector<1x8x16x32xbf16>
    %5 = vector.shape_cast %4 : vector<1x8x16x32xbf16> to vector<8x16x32xbf16>
    %6 = vector.shape_cast %5 : vector<8x16x32xbf16> to vector<128x32xbf16>
    %c0_i32_2 = arith.constant 0 : i32
    %7 = arith.addi %1, %c0_i32_2 : i32
    %c0_3 = arith.constant 0 : index
    %8 = arith.index_cast %7 : i32 to index
    %c1 = arith.constant 1 : index
    %c0_4 = arith.constant 0 : index
    %9 = vector.load %arg2[%c0_3, %8, %c1, %c0_4] : memref<1x18x18x32xbf16, #tpu.memory_space<vmem>>, vector<1x8x16x32xbf16>
    %10 = vector.shape_cast %9 : vector<1x8x16x32xbf16> to vector<8x16x32xbf16>
    %11 = vector.shape_cast %10 : vector<8x16x32xbf16> to vector<128x32xbf16>
    %c0_i32_5 = arith.constant 0 : i32
    %12 = arith.addi %1, %c0_i32_5 : i32
    %c0_6 = arith.constant 0 : index
    %13 = arith.index_cast %12 : i32 to index
    %c2 = arith.constant 2 : index
    %c0_7 = arith.constant 0 : index
    %14 = vector.load %arg2[%c0_6, %13, %c2, %c0_7] : memref<1x18x18x32xbf16, #tpu.memory_space<vmem>>, vector<1x8x16x32xbf16>
    %15 = vector.shape_cast %14 : vector<1x8x16x32xbf16> to vector<8x16x32xbf16>
    %16 = vector.shape_cast %15 : vector<8x16x32xbf16> to vector<128x32xbf16>
    %c1_i32 = arith.constant 1 : i32
    %17 = arith.addi %1, %c1_i32 : i32
    %c0_8 = arith.constant 0 : index
    %18 = arith.index_cast %17 : i32 to index
    %c0_9 = arith.constant 0 : index
    %c0_10 = arith.constant 0 : index
    %19 = vector.load %arg2[%c0_8, %18, %c0_9, %c0_10] : memref<1x18x18x32xbf16, #tpu.memory_space<vmem>>, vector<1x8x16x32xbf16>
    %20 = vector.shape_cast %19 : vector<1x8x16x32xbf16> to vector<8x16x32xbf16>
    %21 = vector.shape_cast %20 : vector<8x16x32xbf16> to vector<128x32xbf16>
    %c1_i32_11 = arith.constant 1 : i32
    %22 = arith.addi %1, %c1_i32_11 : i32
    %c0_12 = arith.constant 0 : index
    %23 = arith.index_cast %22 : i32 to index
    %c1_13 = arith.constant 1 : index
    %c0_14 = arith.constant 0 : index
    %24 = vector.load %arg2[%c0_12, %23, %c1_13, %c0_14] : memref<1x18x18x32xbf16, #tpu.memory_space<vmem>>, vector<1x8x16x32xbf16>
    %25 = vector.shape_cast %24 : vector<1x8x16x32xbf16> to vector<8x16x32xbf16>
    %26 = vector.shape_cast %25 : vector<8x16x32xbf16> to vector<128x32xbf16>
    %c1_i32_15 = arith.constant 1 : i32
    %27 = arith.addi %1, %c1_i32_15 : i32
    %c0_16 = arith.constant 0 : index
    %28 = arith.index_cast %27 : i32 to index
    %c2_17 = arith.constant 2 : index
    %c0_18 = arith.constant 0 : index
    %29 = vector.load %arg2[%c0_16, %28, %c2_17, %c0_18] : memref<1x18x18x32xbf16, #tpu.memory_space<vmem>>, vector<1x8x16x32xbf16>
    %30 = vector.shape_cast %29 : vector<1x8x16x32xbf16> to vector<8x16x32xbf16>
    %31 = vector.shape_cast %30 : vector<8x16x32xbf16> to vector<128x32xbf16>
    %c2_i32 = arith.constant 2 : i32
    %32 = arith.addi %1, %c2_i32 : i32
    %c0_19 = arith.constant 0 : index
    %33 = arith.index_cast %32 : i32 to index
    %c0_20 = arith.constant 0 : index
    %c0_21 = arith.constant 0 : index
    %34 = vector.load %arg2[%c0_19, %33, %c0_20, %c0_21] : memref<1x18x18x32xbf16, #tpu.memory_space<vmem>>, vector<1x8x16x32xbf16>
    %35 = vector.shape_cast %34 : vector<1x8x16x32xbf16> to vector<8x16x32xbf16>
    %36 = vector.shape_cast %35 : vector<8x16x32xbf16> to vector<128x32xbf16>
    %c2_i32_22 = arith.constant 2 : i32
    %37 = arith.addi %1, %c2_i32_22 : i32
    %c0_23 = arith.constant 0 : index
    %38 = arith.index_cast %37 : i32 to index
    %c1_24 = arith.constant 1 : index
    %c0_25 = arith.constant 0 : index
    %39 = vector.load %arg2[%c0_23, %38, %c1_24, %c0_25] : memref<1x18x18x32xbf16, #tpu.memory_space<vmem>>, vector<1x8x16x32xbf16>
    %40 = vector.shape_cast %39 : vector<1x8x16x32xbf16> to vector<8x16x32xbf16>
    %41 = vector.shape_cast %40 : vector<8x16x32xbf16> to vector<128x32xbf16>
    %c2_i32_26 = arith.constant 2 : i32
    %42 = arith.addi %1, %c2_i32_26 : i32
    %c0_27 = arith.constant 0 : index
    %43 = arith.index_cast %42 : i32 to index
    %c2_28 = arith.constant 2 : index
    %c0_29 = arith.constant 0 : index
    %44 = vector.load %arg2[%c0_27, %43, %c2_28, %c0_29] : memref<1x18x18x32xbf16, #tpu.memory_space<vmem>>, vector<1x8x16x32xbf16>
    %45 = vector.shape_cast %44 : vector<1x8x16x32xbf16> to vector<8x16x32xbf16>
    %46 = vector.shape_cast %45 : vector<8x16x32xbf16> to vector<128x32xbf16>
    %47 = tpu.concatenate %6, %11, %16, %21, %26, %31, %36, %41, %46 in 1 : vector<128x32xbf16>, vector<128x32xbf16>, vector<128x32xbf16>, vector<128x32xbf16>, vector<128x32xbf16>, vector<128x32xbf16>, vector<128x32xbf16>, vector<128x32xbf16>, vector<128x32xbf16> -> vector<128x288xbf16>
    %c0_30 = arith.constant 0 : index
    %c0_31 = arith.constant 0 : index
    %48 = vector.load %arg3[%c0_30, %c0_31] : memref<288x128xbf16, #tpu.memory_space<vmem>>, vector<288x128xbf16>
    %cst = arith.constant dense<0.000000e+00> : vector<128x128xf32>
    %49 = tpu.matmul %47, %48, %cst {dimension_numbers = #tpu.dot_dimension_numbers<[1], [0], [0], [1], [0, 0, 1, 1], [], []>} : vector<128x288xbf16>, vector<288x128xbf16>, vector<128x128xf32> -> vector<128x128xf32>
    %50 = vector.shape_cast %49 : vector<128x128xf32> to vector<8x16x128xf32>
    %c0_32 = arith.constant 0 : index
    %c0_33 = arith.constant 0 : index
    %c0_34 = arith.constant 0 : index
    %c0_35 = arith.constant 0 : index
    %51 = vector.load %arg4[%c0_32, %c0_33, %c0_34, %c0_35] : memref<1x8x16x128xf32, #tpu.memory_space<vmem>>, vector<1x8x16x128xf32>
    %52 = vector.shape_cast %51 : vector<1x8x16x128xf32> to vector<8x16x128xf32>
    %53 = vector.shape_cast %50 : vector<8x16x128xf32> to vector<1x8x16x128xf32>
    tpu.vector_store %arg4[%c0_32, %c0_33, %c0_34, %c0_35], %53 {strides = array<i32>} : memref<1x8x16x128xf32, #tpu.memory_space<vmem>>, vector<1x8x16x128xf32>,
    %cst_36 = arith.constant dense<0.000000e+00> : vector<128xf32>
    %54 = vector.multi_reduction <add>, %49, %cst_36 [0] : vector<128x128xf32> to vector<128xf32>
    %55 = vector.shape_cast %54 : vector<128xf32> to vector<1x128xf32>
    %56 = arith.mulf %49, %49 : vector<128x128xf32>
    %cst_37 = arith.constant dense<0.000000e+00> : vector<128xf32>
    %57 = vector.multi_reduction <add>, %56, %cst_37 [0] : vector<128x128xf32> to vector<128xf32>
    %58 = vector.shape_cast %57 : vector<128xf32> to vector<1x128xf32>
    %59 = tpu.concatenate %55, %58 in 0 : vector<1x128xf32>, vector<1x128xf32> -> vector<2x128xf32>
    %60 = vector.shape_cast %59 : vector<2x128xf32> to vector<1x1x2x128xf32>
    %c0_38 = arith.constant 0 : index
    %c0_39 = arith.constant 0 : index
    %c0_40 = arith.constant 0 : index
    %c0_41 = arith.constant 0 : index
    %61 = vector.load %arg5[%c0_38, %c0_39, %c0_40, %c0_41] : memref<1x1x2x128xf32, #tpu.memory_space<vmem>>, vector<1x1x2x128xf32>
    tpu.vector_store %arg5[%c0_38, %c0_39, %c0_40, %c0_41], %60 {strides = array<i32>} : memref<1x1x2x128xf32, #tpu.memory_space<vmem>>, vector<1x1x2x128xf32>,
    return
  }
  func.func @transform_0(%arg0: i32, %arg1: i32) -> (i32, i32, i32, i32) {
    %c0_i32 = arith.constant 0 : i32
    %c0_i32_0 = arith.constant 0 : i32
    %c0_i32_1 = arith.constant 0 : i32
    %c0_i32_2 = arith.constant 0 : i32
    return %arg0, %c0_i32, %c0_i32_0, %c0_i32_1 : i32, i32, i32, i32
  }
  func.func @transform_1(%arg0: i32, %arg1: i32) -> (i32, i32) {
    %c0_i32 = arith.constant 0 : i32
    %c0_i32_0 = arith.constant 0 : i32
    %c0_i32_1 = arith.constant 0 : i32
    return %c0_i32, %c0_i32_0 : i32, i32
  }
  func.func @transform_2(%arg0: i32, %arg1: i32) -> (i32, i32, i32, i32) {
    %c0_i32 = arith.constant 0 : i32
    %c0_i32_0 = arith.constant 0 : i32
    %c0_i32_1 = arith.constant 0 : i32
    return %arg0, %arg1, %c0_i32, %c0_i32_0 : i32, i32, i32, i32
  }
  func.func @transform_3(%arg0: i32, %arg1: i32) -> (i32, i32, i32, i32) {
    %c0_i32 = arith.constant 0 : i32
    %c0_i32_0 = arith.constant 0 : i32
    %c0_i32_1 = arith.constant 0 : i32
    return %arg0, %arg1, %c0_i32, %c0_i32_0 : i32, i32, i32, i32
  }
}

module attributes {stable_mosaic.version = 11 : i64} {
  func.func @bn_relu_kernel(%arg0: i32, %arg1: i32, %arg2: memref<1x8x16x128xf32, #tpu.memory_space<vmem>>, %arg3: memref<1x128xf32, #tpu.memory_space<vmem>>, %arg4: memref<1x128xf32, #tpu.memory_space<vmem>>, %arg5: memref<1x8x16x128xf32, #tpu.memory_space<vmem>>) attributes {dimension_semantics = [#tpu.dimension_semantics<parallel>, #tpu.dimension_semantics<parallel>], iteration_bounds = array<i64: 2, 2>, scalar_prefetch = 0 : i64, scratch_operands = 0 : i64, tpu.core_type = #tpu.core_type<tc>, window_params = [{transform_indices = @transform_0, window_bounds = array<i64: 1, 8, 16, 128>}, {pipeline_mode = #tpu.pipeline_mode<synchronous>, transform_indices = @transform_1, window_bounds = array<i64: 1, 128>}, {pipeline_mode = #tpu.pipeline_mode<synchronous>, transform_indices = @transform_2, window_bounds = array<i64: 1, 128>}, {transform_indices = @transform_3, window_bounds = array<i64: 1, 8, 16, 128>}]} {
    %c0 = arith.constant 0 : index
    %c0_0 = arith.constant 0 : index
    %c0_1 = arith.constant 0 : index
    %c0_2 = arith.constant 0 : index
    %0 = vector.load %arg2[%c0, %c0_0, %c0_1, %c0_2] : memref<1x8x16x128xf32, #tpu.memory_space<vmem>>, vector<1x8x16x128xf32>
    %1 = vector.shape_cast %0 : vector<1x8x16x128xf32> to vector<8x16x128xf32>
    %c0_3 = arith.constant 0 : index
    %c0_4 = arith.constant 0 : index
    %2 = vector.load %arg3[%c0_3, %c0_4] : memref<1x128xf32, #tpu.memory_space<vmem>>, vector<1x128xf32>
    %3 = vector.shape_cast %2 : vector<1x128xf32> to vector<1x1x128xf32>
    %4 = vector.broadcast %3 : vector<1x1x128xf32> to vector<8x16x128xf32>
    %5 = arith.mulf %1, %4 : vector<8x16x128xf32>
    %c0_5 = arith.constant 0 : index
    %c0_6 = arith.constant 0 : index
    %6 = vector.load %arg4[%c0_5, %c0_6] : memref<1x128xf32, #tpu.memory_space<vmem>>, vector<1x128xf32>
    %7 = vector.shape_cast %6 : vector<1x128xf32> to vector<1x1x128xf32>
    %8 = vector.broadcast %7 : vector<1x1x128xf32> to vector<8x16x128xf32>
    %9 = arith.addf %5, %8 : vector<8x16x128xf32>
    %cst = arith.constant 0.000000e+00 : f32
    %10 = vector.broadcast %cst : f32 to vector<8x16x128xf32>
    %11 = arith.maximumf %9, %10 : vector<8x16x128xf32>
    %c0_7 = arith.constant 0 : index
    %c0_8 = arith.constant 0 : index
    %c0_9 = arith.constant 0 : index
    %c0_10 = arith.constant 0 : index
    %12 = vector.load %arg5[%c0_7, %c0_8, %c0_9, %c0_10] : memref<1x8x16x128xf32, #tpu.memory_space<vmem>>, vector<1x8x16x128xf32>
    %13 = vector.shape_cast %12 : vector<1x8x16x128xf32> to vector<8x16x128xf32>
    %14 = vector.shape_cast %11 : vector<8x16x128xf32> to vector<1x8x16x128xf32>
    tpu.vector_store %arg5[%c0_7, %c0_8, %c0_9, %c0_10], %14 {strides = array<i32>} : memref<1x8x16x128xf32, #tpu.memory_space<vmem>>, vector<1x8x16x128xf32>,
    return
  }
  func.func @transform_0(%arg0: i32, %arg1: i32) -> (i32, i32, i32, i32) {
    %c0_i32 = arith.constant 0 : i32
    %c0_i32_0 = arith.constant 0 : i32
    %c0_i32_1 = arith.constant 0 : i32
    return %arg0, %arg1, %c0_i32, %c0_i32_0 : i32, i32, i32, i32
  }
  func.func @transform_1(%arg0: i32, %arg1: i32) -> (i32, i32) {
    %c0_i32 = arith.constant 0 : i32
    %c0_i32_0 = arith.constant 0 : i32
    %c0_i32_1 = arith.constant 0 : i32
    return %c0_i32, %c0_i32_0 : i32, i32
  }
  func.func @transform_2(%arg0: i32, %arg1: i32) -> (i32, i32) {
    %c0_i32 = arith.constant 0 : i32
    %c0_i32_0 = arith.constant 0 : i32
    %c0_i32_1 = arith.constant 0 : i32
    return %c0_i32, %c0_i32_0 : i32, i32
  }
  func.func @transform_3(%arg0: i32, %arg1: i32) -> (i32, i32, i32, i32) {
    %c0_i32 = arith.constant 0 : i32
    %c0_i32_0 = arith.constant 0 : i32
    %c0_i32_1 = arith.constant 0 : i32
    return %arg0, %arg1, %c0_i32, %c0_i32_0 : i32, i32, i32, i32
  }
}

</mosaic_0001>

<bundles_post_ra>
// kernel: double_conv_forward.3
= control target key start
LH: loop header
LB: loop body
LE: loop exit
PB: predicated region body
PF: predicated region fallthrough
CT: control target
= control target key end

     0   :  { %8 = vsyncpa [#allocation3], 0  ;;  %s839_s0 = inlined_call_operand.vmem [shape: f32[2,16,16,128], index: 0, kind: input, shape index: {}]   ;;  %s840_s1 = inlined_call_operand.vmem [shape: f32[1,128], index: 1, kind: input, shape index: {}]   ;;  %s841_s2 = inlined_call_operand.vmem [shape: f32[1,128], index: 2, kind: input, shape index: {}]   ;;  %s842_s3 = inlined_call_operand.hbm [shape: f32[2,16,16,128], index: 3, kind: output, shape index: {}]  }
   0x1   :  { %10 = vsyncpa [#allocation3 + $0x1], 0  ;;  %s611_s12 = smov 0   ;;  %s613_s13 = smov 0  }
   0x2   :  { %s615_s14 = smov 0   ;;  %s617_s15 = smov 0  }
   0x3   :  { %s619_s16 = smov 0   ;;  %s621_s17 = smov 0  }
   0x4   :  { %s623_s18 = smov 0   ;;  %s625_s19 = smov 0  }
   0x5 LB: > { %s399_s20 = sadd.s32 4294967295, %s586_s19   ;;  %s400_s21 = sadd.s32 4294967294, %s586_s19   ;;  %s586_s19 = sphi %s625_s19, %s16_s19   ;;  %s582_s18 = sphi %s623_s18, %s851_s18   ;;  %s578_s17 = sphi %s621_s17, %s850_s17   ;;  %s574_s16 = sphi %s619_s16, %s849_s16   ;;  %s570_s15 = sphi %s617_s15, %s848_s15   ;;  %s566_s14 = sphi %s615_s14, %s847_s14   ;;  %s562_s13 = sphi %s613_s13, %s846_s13   ;;  %s558_s12 = sphi %s611_s12, %s845_s12  }
   0x6   : > { %s25_s22 = sadd.s32 1, %s578_s17  ;;  %s28_s23 = sadd.s32 1, %s582_s18 }
   0x7   : > { %p26_p0 = scmp.ge.s32.totalorder %s25_s22, 2  ;;  %p117_p1 = scmp.ne.s32.totalorder %s566_s14, %s562_s13 }
   0x8   : > { %p118_p2 = scmp.eq.s32.totalorder %s399_s20, 3  ;;  %p123_p5 = scmp.ne.s32.totalorder %s562_s13, %s558_s12 }
   0x9   : > { %s853_s22 = smov (%p26_p0, %s25_s22), 0  ;;  %s855_s23 = smov (!%p26_p0, %s28_s23), %s582_s18 }
   0xa   : > { %s103_s24 = ssub.s32 %s578_s17, %s853_s22  ;;  %p662_p3 = por %p118_p2, %p117_p1 }
   0xb   : > { %p30_p4 = scmp.ge.s32.totalorder %s855_s23, 2  ;;  %p124_p6 = scmp.eq.s32.totalorder %s400_s21, 3 }
   0xc   : > { %p403_p7 = scmp.ge.s32.totalorder %s586_s19, 1  ;;  %p162_p9 = scmp.lt.s32.totalorder %s586_s19, 5 }
   0xd   : > { %s857_s23 = smov (%p30_p4, %s855_s23), 0  ;;  %p671_p8 = por %p124_p6, %p123_p5 }
   0xe   : > { %s102_s27 = ssub.s32 %s582_s18, %s857_s23  ;;  %s107_s28 = sadd.s32 1, %s566_s14 }
   0xf   : > { %s104_s29 = sor.u32 %s103_s24, %s102_s27  ;;  %p163_p10 = pnand %p403_p7, %p162_p9 }
  0x10   : > { %p105_p11 = scmp.eq.s32.totalorder %s104_s29, 0  ;;  %s405_s4 = sshll.u32 (!%p163_p10), %s570_s15, 3  ;;  %v689_v0 = vld [vmem:[%s840_s1] ss:$0 sm:$0xff] (!%p163_p10) }
  0x11   : > { %166 = sbr.rel (%p163_p10) target bundleno = 62 (0x3e), region = 32  ;;  %p192_p12 = scmp.lt.s32.totalorder (!%p163_p10), %s574_s16, 1  ;;  %v699_v1 = vld [vmem:[%s841_s2] ss:$0 sm:$0xff] (!%p163_p10) }
  0x12   : > { %s680_s30 = scalar_select %p105_p11, %s566_s14, %s107_s28  }
  0x13   : > { %p194_p13 = scmp.lt.s32.totalorder (!%p163_p10), %s405_s4, 15  ;;  %s188_s8 = sand.u32 (!%p163_p10), 1, %s562_s13  }
  0x14   : > { %s787_s21 = scalar_lea.sflag (!%p163_p10), [#allocation3], %s188_s8 }
  0x18   : > { %s193_s5 = scalar_select %p192_p12, %s574_s16, 1 }
  0x19   : > { %s859_s4 = smov (!%p194_p13, %s405_s4), 15 }
  0x1a   : > { %s407_s6 = sshll.u32 %s193_s5, 5  ;;  %s406_s7 = sshll.u32 %s859_s4, 1 }
  0x1b   : > { %s198_s9 = sadd.s32 %s407_s6, %s406_s7  ;;  %s703_s4 = sshll.u32 %s188_s8, 7 }
  0x1c   : > { %s408_s10 = sshll.u32 %s198_s9, 3  ;;  %s418_s5 = sshll.u32 %s570_s15, 4 }
  0x1d   : > { %s694_s27 = scalar_lea.vmem %s839_s0, %s408_s10  ;;  %s414_s6 = sshll.u32 %s574_s16, 5 }
  0x1e   : > { %v203_v2 = vld [vmem:[%s694_s27] sm:$0xff]  ;;  %v204_v3 = vld [vmem:[%s694_s27 + $0x8] sm:$0xff]  ;;  %v205_v4 = vld [vmem:[%s694_s27 + $0x10] sm:$0xff]  ;;  %s739_s7 = scalar_lea.vmem [#allocation2], %s703_s4  ;;  %s748_s15 = sadd.s32 %s418_s5, %s414_s6 }
  0x1f   : > { %v226_v5 = vmul.f32 %v689_v0, %v203_v2  ;;  %v227_v6 = vmul.f32 %v689_v0, %v204_v3  ;;  %v228_v7 = vmul.f32 %v689_v0, %v205_v4  ;;  %v206_v8 = vld [vmem:[%s694_s27 + $0x18] sm:$0xff]  ;;  %v207_v9 = vld [vmem:[%s694_s27 + $0x20] sm:$0xff]  ;;  %v208_v10 = vld [vmem:[%s694_s27 + $0x28] sm:$0xff]  ;;  %s415_s16 = sshll.u32 %s748_s15, 7  ;;  %s314_s9 = sshll.u32 %s739_s7, 4  ;;  %s778_s9 = int_to_ptr.vmem [resolvable:$true] %s314_s9 }
  0x20   : > { %v229_v11 = vmul.f32 %v689_v0, %v206_v8  ;;  %v230_v12 = vmul.f32 %v689_v0, %v207_v9  ;;  %v231_v13 = vmul.f32 %v689_v0, %v208_v10  ;;  %v209_v14 = vld [vmem:[%s694_s27 + $0x30] sm:$0xff]  ;;  %v210_v15 = vld [vmem:[%s694_s27 + $0x38] sm:$0xff]  ;;  %v211_v24 = vld [vmem:[%s694_s27 + $0x40] sm:$0xff]  ;;  %s776_s20 = scalar_lea.hbm %s842_s3, %s415_s16  ;;  %s492_s24 = scalar_lea.vmem %s778_s9, 2048 }
  0x21   : > { %v249_v16 = vadd.f32 %v699_v1, %v226_v5  ;;  %v250_v17 = vadd.f32 %v699_v1, %v227_v6  ;;  %v251_v18 = vadd.f32 %v699_v1, %v228_v7  ;;  %v232_v19 = vmul.f32 %v689_v0, %v209_v14  ;;  %v212_v25 = vld [vmem:[%s694_s27 + $0x48] sm:$0xff]  ;;  %v213_v26 = vld [vmem:[%s694_s27 + $0x50] sm:$0xff]  ;;  %v214_v31 = vld [vmem:[%s694_s27 + $0x58] sm:$0xff]  ;;  %p493_p0 = scmp.ne.s32.totalorder %s778_s9, %s492_s24 }
  0x22   : > { %v252_v20 = vadd.f32 %v699_v1, %v229_v11  ;;  %v253_v21 = vadd.f32 %v699_v1, %v230_v12  ;;  %v254_v22 = vadd.f32 %v699_v1, %v231_v13  ;;  %v233_v23 = vmul.f32 %v689_v0, %v210_v15  ;;  %v215_v32 = vld [vmem:[%s694_s27 + $0x60] sm:$0xff]  ;;  %v216_v33 = vld [vmem:[%s694_s27 + $0x68] sm:$0xff]  ;;  %v217_v38 = vld [vmem:[%s694_s27 + $0x70] sm:$0xff] }
  0x23   : > { %v265_v27 = vmax.f32 %v249_v16, 0.0  ;;  %v266_v28 = vmax.f32 %v250_v17, 0.0  ;;  %v267_v29 = vmax.f32 %v251_v18, 0.0  ;;  %v255_v30 = vadd.f32 %v699_v1, %v232_v19  ;;  %v218_v43 = vld [vmem:[%s694_s27 + $0x78] sm:$0xff]  ;;  %p494_p1 = pnand %p493_p0, %p662_p3  ;;  %s588_s27 = smov [#allocation2]  }
  0x24   : > { %v268_v34 = vmax.f32 %v252_v20, 0.0  ;;  %v269_v35 = vmax.f32 %v253_v21, 0.0  ;;  %v270_v36 = vmax.f32 %v254_v22, 0.0  ;;  %v256_v37 = vadd.f32 %v699_v1, %v233_v23  ;;  %s496_s28 = sshll.u32 %s588_s27, 4  ;;  %s497_s28 = int_to_ptr.vmem [resolvable:$false] %s496_s28 }
  0x25   : > { %281 = vst [vmem:[%s739_s7] sm:$0xff] %v265_v27  ;;  %282 = vst [vmem:[%s739_s7 + $0x8] sm:$0xff] %v266_v28  ;;  %v271_v39 = vmax.f32 %v255_v30, 0.0  ;;  %v234_v40 = vmul.f32 %v689_v0, %v211_v24  ;;  %v235_v41 = vmul.f32 %v689_v0, %v212_v25  ;;  %v236_v42 = vmul.f32 %v689_v0, %v213_v26  ;;  %p495_p2 = pneg %p494_p1  ;;  %s498_s29 = scalar_lea.vmem %s497_s28, 4096 }
  0x26   : > { %283 = vst [vmem:[%s739_s7 + $0x10] sm:$0xff] %v267_v29  ;;  %284 = vst [vmem:[%s739_s7 + $0x18] sm:$0xff] %v268_v34  ;;  %v272_v44 = vmax.f32 %v256_v37, 0.0  ;;  %v237_v45 = vmul.f32 %v689_v0, %v214_v31  ;;  %v238_v46 = vmul.f32 %v689_v0, %v215_v32  ;;  %v239_v47 = vmul.f32 %v689_v0, %v216_v33  ;;  %p499_p4 = scmp.lt.s32.totalorder %s778_s9, %s497_s28  ;;  %p500_p5 = scmp.lt.s32.totalorder %s498_s29, %s492_s24 }
  0x27   : > { %285 = vst [vmem:[%s739_s7 + $0x20] sm:$0xff] %v269_v35  ;;  %286 = vst [vmem:[%s739_s7 + $0x28] sm:$0xff] %v270_v36  ;;  %v257_v48 = vadd.f32 %v699_v1, %v234_v40  ;;  %v258_v49 = vadd.f32 %v699_v1, %v235_v41  ;;  %v259_v50 = vadd.f32 %v699_v1, %v236_v42 }
  0x28   : > { %287 = vst [vmem:[%s739_s7 + $0x30] sm:$0xff] %v271_v39  ;;  %v240_v51 = vmul.f32 %v689_v0, %v217_v38  ;;  %288 = vst [vmem:[%s739_s7 + $0x38] sm:$0xff] %v272_v44  ;;  %v260_v52 = vadd.f32 %v699_v1, %v237_v45  ;;  %v261_v53 = vadd.f32 %v699_v1, %v238_v46  ;;  %p501_p6 = por %p500_p5, %p499_p4 }
  0x29   : > { %v262_v54 = vadd.f32 %v699_v1, %v239_v47  ;;  %v241_v55 = vmul.f32 %v689_v0, %v218_v43  ;;  %v273_v56 = vmax.f32 %v257_v48, 0.0  ;;  %v274_v57 = vmax.f32 %v258_v49, 0.0 }
  0x2a   : > { %v275_v58 = vmax.f32 %v259_v50, 0.0  ;;  %v263_v59 = vadd.f32 %v699_v1, %v240_v51  ;;  %v276_v60 = vmax.f32 %v260_v52, 0.0  ;;  %v277_v61 = vmax.f32 %v261_v53, 0.0  ;;  %p502_p7 = pnand %p501_p6, %p495_p2 }
  0x2b   : > { %v278_v62 = vmax.f32 %v262_v54, 0.0  ;;  %v264_v63 = vadd.f32 %v699_v1, %v241_v55  ;;  %289 = vst [vmem:[%s739_s7 + $0x40] sm:$0xff] %v273_v56  ;;  %290 = vst [vmem:[%s739_s7 + $0x48] sm:$0xff] %v274_v57 }
  0x2c   : > { %291 = vst [vmem:[%s739_s7 + $0x50] sm:$0xff] %v275_v58  ;;  %v279_v0 = vmax.f32 %v263_v59, 0.0  ;;  %292 = vst [vmem:[%s739_s7 + $0x58] sm:$0xff] %v276_v60 }
  0x2d   : > { %293 = vst [vmem:[%s739_s7 + $0x60] sm:$0xff] %v277_v61  ;;  %294 = vst [vmem:[%s739_s7 + $0x68] sm:$0xff] %v278_v62  ;;  %v280_v2 = vmax.f32 %v264_v63, 0.0 }
  0x2e   : > { %295 = vst [vmem:[%s739_s7 + $0x70] sm:$0xff] %v279_v0 }
  0x2f   : > { %296 = vst [vmem:[%s739_s7 + $0x78] sm:$0xff] %v280_v2 }
  0x30   : > { %505 = shalt.err (!%p502_p7)
}
  0x31   : > { %s506_s8 = scalar_lea.hbm %s776_s20, 2048  ;;  %s510_s6 = scalar_lea.hbm %s842_s3, 8192 }
  0x32   : > { %p507_p9 = scmp.ne.s32.totalorder %s776_s20, %s506_s8  ;;  %p511_p12 = scmp.lt.u32.totalorder %s776_s20, %s842_s3 }
  0x33   : > { %p512_p13 = scmp.lt.u32.totalorder %s510_s6, %s506_s8  ;;  %p514_p1 = scmp.lt.u32.totalorder %s506_s8, %s776_s20 }
  0x34   : > { %p508_p10 = pnand %p507_p9, %p662_p3 }
  0x35   : > { %p513_p0 = por %p512_p13, %p511_p12 }
  0x36   : > { %p509_p11 = pneg %p508_p10 }
  0x37   : > { %p515_p2 = por %p514_p1, %p513_p0 }
  0x39   : > { %p516_p4 = pnand %p515_p2, %p509_p11 }
  0x3b   : > { %519 = shalt.err (!%p516_p4)
}
  0x3c   : > { %s589_s16 = smov 128   ;;  %s590_s10 = smov 8  }
  0x3d   : > { %419 = dma.vmem_to_hbm [thread:$0]  (%p662_p3), %s778_s9, 2048, %s776_s20, %s787_s21, %s589_s16, %s589_s16, %s590_s10  }
  0x3e PF: > { %p425_p5 = scmp.ge.s32.totalorder %s586_s19, 2  ;;  %s329_s11 = sand.u32 1, %s558_s12  }
  0x3f   : > { %s330_s24 = scalar_lea.sflag [#allocation3], %s329_s11 }
  0x40   : > { %p422_p6 = pnand %p425_p5, %p671_p8 }
  0x42   : > { %553 = dma.done.wait (!%p422_p6), %s330_s24, 2048  }
  0x43   : > { %555 = vsyncadd (!%p422_p6), %s330_s24, 4294965248  ;;  %s16_s19 = sadd.s32 1, %s586_s19   ;;  %s845_s12 = smov %s562_s13 }
  0x44   : > { %p13_p7 = scmp.ge.s32.totalorder %s16_s19, 6   ;;  %s846_s13 = smov %s566_s14 }
  0x45   : > { %s847_s14 = smov %s680_s30  ;;  %s848_s15 = smov %s578_s17 }
  0x46   : > { %s849_s16 = smov %s582_s18  ;;  %s850_s17 = smov %s853_s22 }
  0x47   : > { %s851_s18 = smov %s857_s23  ;;  %15 = sbr.rel (!%p13_p7) target bundleno = 5 (0x5), region = 67 }
  0x4e   :  { %335 = vsyncpa [#allocation3], 1 }
  0x4f   :  { %337 = vsyncpa [#allocation3 + $0x1], 1 }

// kernel: double_conv_forward.2
= control target key start
LH: loop header
LB: loop body
LE: loop exit
PB: predicated region body
PF: predicated region fallthrough
CT: control target
= control target key end

     0   :  { %s2680_s12 = smov 0   ;;  %s2682_s13 = smov 0   ;;  %s3793_s0 = inlined_call_operand.vmem [shape: bf16[2,18,18,32], index: 0, kind: input, shape index: {}]   ;;  %s3794_s1 = inlined_call_operand.vmem [shape: bf16[288,128], index: 1, kind: input, shape index: {}]   ;;  %s3795_s2 = inlined_call_operand.vmem [shape: f32[2,16,16,128], index: 2, kind: output, shape index: {0}]   ;;  %s3796_s3 = inlined_call_operand.vmem [shape: f32[2,2,2,128], index: 3, kind: output, shape index: {1}]  }
   0x1   :  { %s2684_s14 = smov 0   ;;  %s2686_s15 = smov 0  }
   0x2   :  { %s2688_s16 = smov 0  }
   0x3 LB: > { %s23_s17 = sadd.s32 1, %s2647_s14  ;;  %s26_s18 = sadd.s32 1, %s2651_s15  ;;  %s2655_s16 = sphi %s2688_s16, %s14_s16   ;;  %s2651_s15 = sphi %s2686_s15, %s3864_s15   ;;  %s2647_s14 = sphi %s2684_s14, %s3863_s14   ;;  %s2643_s13 = sphi %s2682_s13, %s3862_s13   ;;  %s2639_s12 = sphi %s2680_s12, %s3861_s12  }
   0x4   : > { %p24_p0 = scmp.ge.s32.totalorder %s23_s17, 2  ;;  %p2205_p1 = scmp.ge.s32.totalorder %s2655_s16, 1 }
   0x5   : > { %p156_p2 = scmp.lt.s32.totalorder %s2655_s16, 5 }
   0x6   : > { %s3866_s17 = smov (%p24_p0, %s23_s17), 0  ;;  %s3868_s18 = smov (!%p24_p0, %s26_s18), %s2651_s15 }
   0x7   : > { %p157_p3 = pnand %p2205_p1, %p156_p2  ;;  %p28_p4 = scmp.ge.s32.totalorder %s3868_s18, 2 }
   0x9   : > { %s3870_s18 = smov (%p28_p4, %s3868_s18), 0  ;;  %160 = sbr.rel (%p157_p3) target bundleno = 508 (0x1fc), region = 28 }
  0x10   : > { %p193_p5 = scmp.lt.s32.totalorder %s2643_s13, 1  ;;  %s2408_s19 = smul.u32 96, %s2639_s12  ;;  %vm473_vm0 = vcmask 1042432   ;;  %v2579_v7 = vld [vmem:[%s3794_s1 + $0x40] sm:$0xff]   ;;  %vm474_vm1 = vcmask 1046532   ;;  %v2581_v45 = vld [vmem:[%s3794_s1 + $0x48] sm:$0xff]  }
  0x11   : > { %s2657_s27 = smov 64   ;;  %2409 = vmatprep.subr.bf16.mxu0 %v2579_v7  ;;  %v2580_v16 = vld [vmem:[%s3794_s1] sm:$0xff]   ;;  %2503 = vmatprep.subr.bf16.mxu1 %v2579_v7  ;;  %vm2774_vm2 = vmor %vm473_vm0, %vm474_vm1  ;;  %s2658_s30 = smov 96   ;;  %v2582_v51 = vld [vmem:[%s3794_s1 + $0x8] sm:$0xff]   ;;  %vm246_vm3 = vsmask.f32 3328 }
  0x12   : > { %s3872_s13 = smov (!%p193_p5, %s2643_s13), 1  ;;  %2410 = vmatpush3.bf16.msra.mxu0 %v2580_v16  ;;  %2511 = vmatpush3.bf16.msra.mxu1 %v2580_v16  ;;  %vm247_vm4 = vsmask.f32 7440  ;;  %v2583_v57 = vld [vmem:[%s3794_s1 + $0x50] sm:$0xff]   ;;  %vm1484_vm6 = vcmask 261120   ;;  %vm1509_vm7 = vcmask 523264  }
  0x13   : > { %s2519_s20 = smul.u32 216, %s3872_s13  ;;  %2411 = vmatprep.subr.bf16.mxu0 %v2581_v45  ;;  %2504 = vmatprep.subr.bf16.mxu1 %v2581_v45  ;;  %vm2882_vm5 = vmor %vm246_vm3, %vm247_vm4  ;;  %vm1526_vm8 = vcmask 785408   ;;  %s2209_s28 = sshll.u32 %s3872_s13, 5  ;;  %vm2051_vm9 = vcmask 1040384  }
  0x14   : > { %p211_p7 = scmp.lt.s32.totalorder %s2639_s12, 1  ;;  %s2211_s8 = sshll.u32 %s3872_s13, 1 }
  0x15   : > { %s197_s23 = scalar_lea.vmem %s3793_s0, %s2519_s20 }
  0x16   : > { %s2719_s24 = scalar_lea.vmem %s197_s23, %s2408_s19  ;;  %2412 = vmatpush3.bf16.msra.mxu0 %v2582_v51  ;;  %2512 = vmatpush3.bf16.msra.mxu1 %v2582_v51  ;;  %s2659_s19 = smov 32  }
  0x17   : > { %v2268_v0 = vld [vmem:[%s2719_s24 + $0x18] sm:$0xf]  ;;  %v2723_v1 = vld [vmem:[%s2719_s24 + $0x1c] sm:$0xf]  ;;  %v2280_v2 = vld [vmem:[%s2719_s24 + $0x60] sm:$0xf]  ;;  %2413 = vmatprep.subr.bf16.mxu0 %v2583_v57  ;;  %2505 = vmatprep.subr.bf16.mxu1 %v2583_v57 }
  0x18   : > { %v882_v3 = vshrl.u32 %v2723_v1, 16  ;;  %v3798_v4 = vrot.slane %v2723_v1, 5  ;;  %v2356_v5 = vcombine.low %v2268_v0, %v2723_v1  ;;  %v2730_v6 = vld [vmem:[%s2719_s24 + $0x64] sm:$0xf]  ;;  %v869_v8 = vshrl.u32 %v2268_v0, 16 }
  0x19   : > { %3811 = vst [vmem:[#allocation2_spill] sm:$0xff] %v2730_v6  ;;  %v872_v9 = vshll.u32 %v2268_v0, 16  ;;  %v1026_v10 = vshrl.u32 %v2730_v6, 16  ;;  %v878_v11 = vshll.u32 %v2723_v1, 16  ;;  %v1022_v12 = vshll.u32 %v2730_v6, 16 }
  0x1a   : > { %1404 = vrot.lane.b32.xlu1 %v2356_v5, %s2657_s27  ;;  %v3797_v13 = vrot.slane %v2730_v6, 5  ;;  %v2362_v14 = vcombine.low %v2280_v2, %v2730_v6  ;;  %v2742_v15 = vld [vmem:[%s2719_s24 + $0xc] sm:$0xf]  ;;  %v2747_v17 = vrot.slane %v882_v3, 4  ;;  %v871_v18 = vrot.slane %v869_v8, 4  ;;  %v2584_v8 = vld [vmem:[%s3794_s1 + $0x10] sm:$0xff]  }
  0x1b   : > { %v874_v19 = vrot.slane %v872_v9, 5  ;;  %v1013_v20 = vshrl.u32 %v2280_v2, 16  ;;  %v2751_v21 = vrot.slane %v3798_v4, 4  ;;  %v1016_v22 = vshll.u32 %v2280_v2, 16  ;;  %v2755_v23 = vld [vmem:[%s2719_s24 + $0x10] sm:$0xf]  ;;  %2414 = vmatpush3.bf16.msra.mxu0 %v2584_v8  ;;  %2513 = vmatpush3.bf16.msra.mxu1 %v2584_v8 }
  0x1c   : > { %1416 = vrot.lane.b32.xlu0 %v2362_v14, %s2657_s27  ;;  %v2250_v24 = vld [vmem:[%s2719_s24 + $0xc] sm:$0xe]  ;;  %v2758_v25 = vrot.slane %v1026_v10, 4  ;;  %v2762_v26 = vrot.slane %v3797_v13, 4  ;;  %v2332_v27 = vcombine.low %v2742_v15, %v2755_v23  ;;  %v2767_v28 = vld [vmem:[%s2719_s24 + $0x14] sm:$0x1] }
  0x1d   : > { %v2770_v29 = vld [vmem:[%s2719_s24 + $0x4] sm:$0xf]  ;;  %v875_v30 = vor.u32 %v874_v19, %v871_v18  ;;  %v1015_v31 = vrot.slane %v1013_v20, 4  ;;  %v1018_v32 = vrot.slane %v1016_v22, 5  ;;  %v2779_v34 = vld [vmem:[%s2719_s24 + $0x8] sm:$0x1] }
  0x1e   : > { %3812 = vst [vmem:[#allocation3_spill] sm:$0xff] %v2762_v26  ;;  %v441_v35 = vld [vmem:[%s2719_s24] sm:$0xe]  ;;  %v574_v37 = vshrl.u32 %v2755_v23, 16  ;;  %1292 = vrot.lane.b32.xlu1 %v2332_v27, %s2658_s30  ;;  %v2258_v38 = vrot.slane %v2250_v24, 9  ;;  %v786_v39 = vrot.slane %v2755_v23, 5 }
  0x1f   : > { %v2787_v40 = vld [vmem:[%s2719_s24 + $0x58] sm:$0xf]  ;;  %v561_v41 = vshrl.u32 %v2742_v15, 16  ;;  %v789_v42 = vrot.slane %v2767_v28, 5  ;;  %v2216_v43 = vrot.slane %v441_v35, 9  ;;  %v478_v48 = vrot.slane %v2770_v29, 5 }
  0x20   : > { %v2792_v44 = vld [vmem:[%s2719_s24 + $0x5c] sm:$0x1]  ;;  %v787_v46 = vsel %vm2774_vm2, %v2258_v38, %v786_v39  ;;  %v788_v47 = vrot.slane %v786_v39, 4  ;;  %v481_v49 = vrot.slane %v2779_v34, 5  ;;  %v2256_v50 = vld [vmem:[%s2719_s24 + $0x54] sm:$0xe]  ;;  %v1019_v53 = vor.u32 %v1018_v32, %v1015_v31 }
  0x21   : > { %v2805_v52 = vrot.slane %v875_v30, 4  ;;  %v564_v54 = vshll.u32 %v2742_v15, 16  ;;  %v2264_v55 = vrot.slane %v2256_v50, 9  ;;  %v2809_v56 = vld [vmem:[%s2719_s24 + $0x4c] sm:$0xf]  ;;  %v479_v59 = vsel %vm2774_vm2, %v2216_v43, %v478_v48  ;;  %v2585_v31 = vld [vmem:[%s3794_s1 + $0x58] sm:$0xff]  }
  0x22   : > { %v790_v58 = vsel %vm2774_vm2, %v788_v47, %v789_v42  ;;  %v480_v60 = vrot.slane %v478_v48, 4  ;;  %v828_v61 = vrot.slane %v2787_v40, 5  ;;  %v2820_v62 = vld [vmem:[%s2719_s24 + $0x50] sm:$0x1]  ;;  %v447_v63 = vld [vmem:[%s2719_s24 + $0x48] sm:$0xe]  ;;  %2415 = vmatprep.subr.bf16.mxu0 %v2585_v31  ;;  %2506 = vmatprep.subr.bf16.mxu1 %v2585_v31 }
  0x23   : > { %v2823_v0 = vrot.slane %v561_v41, 4  ;;  %v2348_v2 = vcombine.low %v787_v46, %v790_v58  ;;  %v831_v3 = vrot.slane %v2792_v44, 5  ;;  %v2222_v5 = vrot.slane %v447_v63, 9  ;;  %v2827_v7 = vld [vmem:[%s2719_s24 + $0x1c] sm:$0xf]  ;;  %v2590_v15 = vld [vmem:[%s3794_s1 + $0x28] sm:$0xff]  }
  0x24   : > { %v482_v9 = vsel %vm2774_vm2, %v480_v60, %v481_v49  ;;  %v829_v10 = vsel %vm2774_vm2, %v2264_v55, %v828_v61  ;;  %v830_v14 = vrot.slane %v828_v61, 4  ;;  %v520_v16 = vrot.slane %v2809_v56, 5  ;;  %v2838_v18 = vld [vmem:[%s2719_s24 + $0x20] sm:$0x1]  ;;  %v2251_v19 = vld [vmem:[%s2719_s24 + $0x18] sm:$0xe] }
  0x25   : > { %v2841_v20 = vrot.slane %v1019_v53, 4  ;;  %1356 = vrot.lane.b32.xlu0 %v2348_v2, %s2659_s19  ;;  %v2324_v22 = vcombine.low %v479_v59, %v482_v9  ;;  %v523_v24 = vrot.slane %v2820_v62, 5  ;;  %v2259_v27 = vrot.slane %v2251_v19, 9  ;;  %v234_v30 = vld [vmem:[%s2719_s24 + $0x48] sm:$0xf]  ;;  %v2586_v47 = vld [vmem:[%s3794_s1 + $0x18] sm:$0xff]  }
  0x26   : > { %v832_v32 = vsel %vm2774_vm2, %v830_v14, %v831_v3  ;;  %v521_v35 = vsel %vm2774_vm2, %v2222_v5, %v520_v16  ;;  %v522_v38 = vrot.slane %v520_v16, 4  ;;  %v793_v39 = vrot.slane %v2827_v7, 5  ;;  %v222_v46 = vld [vmem:[%s2719_s24] sm:$0xf]  ;;  %2416 = vmatpush3.bf16.msra.mxu0 %v2586_v47  ;;  %2514 = vmatpush3.bf16.msra.mxu1 %v2586_v47 }
  0x27   : > { %1244 = vrot.lane.b32.xlu1 %v2324_v22, %s2657_s27  ;;  %v2354_v41 = vcombine.low %v829_v10, %v832_v32  ;;  %v796_v42 = vrot.slane %v2838_v18, 5  ;;  %v394_v43 = vshrl.u32 %v234_v30, 16  ;;  %v397_v45 = vshll.u32 %v234_v30, 16  ;;  %v2587_v59 = vld [vmem:[%s3794_s1 + $0x60] sm:$0xff]   ;;  %v2878_v10 = vld [vmem:[%s2719_s24 + $0x68] sm:$0x1] }
  0x28   : > { %v524_v48 = vsel %vm2774_vm2, %v522_v38, %v523_v24  ;;  %v794_v49 = vsel %vm2774_vm2, %v2259_v27, %v793_v39  ;;  %v795_v50 = vrot.slane %v793_v39, 4  ;;  %v403_v51 = vshll.u32 %v2809_v56, 16  ;;  %v2588_v3 = vld [vmem:[%s3794_s1 + $0x20] sm:$0xff]   ;;  %3815 = vst [vmem:[#allocation4_spill] sm:$0xff] %v2878_v10  ;;  %2417 = vmatprep.subr.bf16.mxu0 %v2587_v59  ;;  %2507 = vmatprep.subr.bf16.mxu1 %v2587_v59  ;;  %v2589_v32 = vld [vmem:[%s3794_s1 + $0x68] sm:$0xff]  }
  0x29   : > { %1368 = vrot.lane.b32.xlu0 %v2354_v41, %s2659_s19  ;;  %v2330_v53 = vcombine.low %v521_v35, %v524_v48  ;;  %v396_v55 = vrot.slane %v394_v43, 4  ;;  %v399_v57 = vrot.slane %v397_v45, 5  ;;  %v407_v58 = vshrl.u32 %v2809_v56, 16  ;;  %v2903_v45 = vld [vmem:[%s2719_s24 + $0x20] sm:$0x1] }
  0x2a   : > { %v797_v60 = vsel %vm2774_vm2, %v795_v50, %v796_v42  ;;  %v405_v61 = vrot.slane %v403_v51, 5  ;;  %v413_v63 = vshll.u32 %v2820_v62, 16  ;;  %v250_v2 = vshrl.u32 %v222_v46, 16  ;;  %2418 = vmatpush3.bf16.msra.mxu0 %v2588_v3  ;;  %2515 = vmatpush3.bf16.msra.mxu1 %v2588_v3 }
  0x2b   : > { %1256 = vrot.lane.b32.xlu1 %v2330_v53, %s2657_s27  ;;  %v2349_v56 = vcombine.low %v794_v49, %v797_v60  ;;  %v400_v5 = vor.u32 %v399_v57, %v396_v55  ;;  %v409_v8 = vrot.slane %v407_v58, 4  ;;  %v253_v9 = vshll.u32 %v222_v46, 16  ;;  %2419 = vmatprep.subr.bf16.mxu0 %v2589_v32 }
  0x2c   : > { %v415_v14 = vrot.slane %v413_v63, 5  ;;  %v252_v16 = vrot.slane %v250_v2, 4  ;;  %v259_v19 = vshll.u32 %v2770_v29, 16  ;;  %v263_v22 = vshrl.u32 %v2770_v29, 16  ;;  %2508 = vmatprep.subr.bf16.mxu1 %v2589_v32  ;;  %v224_v63 = vld [vmem:[%s2719_s24 + $0xc] sm:$0xf] }
  0x2d   : > { %1358 = vrot.lane.b32.xlu0 %v2349_v56, %s2659_s19  ;;  %v401_v24 = vrot.slane %v400_v5, 4  ;;  %v410_v27 = vor.u32 %v409_v8, %v405_v61  ;;  %v255_v30 = vrot.slane %v253_v9, 5  ;;  %v269_v31 = vshll.u32 %v2779_v34, 16  ;;  %v2595_v2 = vld [vmem:[%s3794_s1 + $0x78] sm:$0xff]   ;;  %v2943_v5 = vld [vmem:[%s2719_s24 + $0x54] sm:$0xf] }
  0x2e   : > { %v261_v35 = vrot.slane %v259_v19, 5  ;;  %v265_v38 = vrot.slane %v263_v22, 4  ;;  %v1024_v39 = vrot.slane %v1022_v12, 5  ;;  %v1032_v29 = vshll.u32 %v2878_v10, 16  ;;  %2420 = vmatpush3.bf16.msra.mxu0 %v2590_v15  ;;  %2516 = vmatpush3.bf16.msra.mxu1 %v2590_v15  ;;  %v225_v8 = vld [vmem:[%s2719_s24 + $0x10] sm:$0xf] }
  0x2f   : > { %v2898_v41 = vrot.slane %v564_v54, 5  ;;  %v406_v34 = vsel %vm2882_vm5, %v401_v24, %v405_v61  ;;  %v411_v42 = vrot.slane %v410_v27, 4  ;;  %v256_v43 = vor.u32 %v255_v30, %v252_v16  ;;  %v442_v30 = vld [vmem:[%s2719_s24 + $0xc] sm:$0xe]  ;;  %v2254_v22 = vld [vmem:[%s2719_s24 + $0x3c] sm:$0xe] }
  0x30   : > { %v266_v46 = vor.u32 %v265_v38, %v261_v35  ;;  %v271_v47 = vrot.slane %v269_v31, 5  ;;  %v1029_v12 = vor.u32 %v2758_v25, %v1024_v39  ;;  %v1034_v48 = vrot.slane %v1032_v29, 5  ;;  %v2591_v25 = vld [vmem:[%s3794_s1 + $0x70] sm:$0xff]   ;;  %v2596_v31 = vld [vmem:[%s3794_s1 + $0x38] sm:$0xff]  }
  0x31   : > { %v416_v54 = vsel %vm2882_vm5, %v411_v42, %v415_v14  ;;  %v257_v49 = vrot.slane %v256_v43, 4  ;;  %v1025_v50 = vsel %vm2882_vm5, %v2841_v20, %v1024_v39  ;;  %v880_v51 = vrot.slane %v878_v11, 5  ;;  %v2593_v20 = vld [vmem:[%s3794_s1 + $0x30] sm:$0xff]   ;;  %2421 = vmatprep.subr.bf16.mxu0 %v2591_v25  ;;  %2509 = vmatprep.subr.bf16.mxu1 %v2591_v25  ;;  %v2962_v42 = vld [vmem:[%s2719_s24 + $0x24] sm:$0xf] }
  0x32   : > { %v2322_v53 = vcombine.low %v406_v34, %v416_v54  ;;  %v267_v55 = vrot.slane %v266_v46, 4  ;;  %v1030_v57 = vrot.slane %v1029_v12, 4  ;;  %v888_v58 = vshll.u32 %v2903_v45, 16  ;;  %2422 = vmatpush3.bf16.msra.mxu0 %v2593_v20  ;;  %2517 = vmatpush3.bf16.msra.mxu1 %v2593_v20 }
  0x33   : > { %v2925_v11 = vrot.slane %v574_v37, 4  ;;  %v262_v60 = vsel %vm2882_vm5, %v257_v49, %v261_v35  ;;  %v885_v61 = vor.u32 %v2747_v17, %v880_v51  ;;  %v567_v37 = vor.u32 %v2898_v41, %v2823_v0  ;;  %v239_v0 = vld [vmem:[%s2719_s24 + $0x14] sm:$0x1]  ;;  %2423 = vmatprep.subr.bf16.mxu0 %v2595_v2  ;;  %2510 = vmatprep.subr.bf16.mxu1 %v2595_v2 }
  0x34   : > { %1216 = vrot.lane.b32.xlu1 %v2322_v53, %s2659_s19  ;;  %v272_v3 = vsel %vm2882_vm5, %v267_v55, %v271_v47  ;;  %v1035_v17 = vsel %vm2882_vm5, %v1030_v57, %v1034_v48  ;;  %v890_v56 = vrot.slane %v888_v58, 5  ;;  %v881_v16 = vsel %vm2882_vm5, %v2805_v52, %v880_v51  ;;  %v2969_v51 = vld [vmem:[%s2719_s24 + $0x28] sm:$0xf] }
  0x35   : > { %v2316_v9 = vcombine.low %v262_v60, %v272_v3  ;;  %v2370_v14 = vcombine.low %v1025_v50, %v1035_v17  ;;  %v886_v19 = vrot.slane %v885_v61, 4  ;;  %v274_v24 = vshrl.u32 %v224_v63, 16 }
  0x36   : > { %v277_v27 = vshll.u32 %v224_v63, 16  ;;  %v2338_v52 = vcombine.low %v2943_v5, %v2787_v40  ;;  %v283_v35 = vshll.u32 %v225_v8, 16  ;;  %v287_v38 = vshrl.u32 %v225_v8, 16  ;;  %2424 = vmatpush3.bf16.msra.mxu0 %v2596_v31  ;;  %2518 = vmatpush3.bf16.msra.mxu1 %v2596_v31 }
  0x37   : > { %1204 = vrot.lane.b32.xlu0 %v2316_v9, %s2659_s19  ;;  %v891_v32 = vsel %vm2882_vm5, %v886_v19, %v890_v56  ;;  %v276_v29 = vrot.slane %v274_v24, 4  ;;  %v293_v34 = vshll.u32 %v239_v0, 16  ;;  %v2964_v43 = vrot.slane %v567_v37, 4  ;;  %v236_v24 = vld [vmem:[%s2719_s24 + $0x54] sm:$0xf] }
  0x38   : > { %1456 = vrot.lane.b32.xlu1 %v2370_v14, %s2658_s30  ;;  %v2364_v39 = vcombine.low %v881_v16, %v891_v32  ;;  %v279_v41 = vrot.slane %v277_v27, 5  ;;  %v285_v46 = vrot.slane %v283_v35, 5  ;;  %v289_v47 = vrot.slane %v287_v38, 4 }
  0x39   : > { %v2217_v12 = vrot.slane %v442_v30, 9  ;;  %v485_v15 = vrot.slane %v225_v8, 5  ;;  %v488_v54 = vrot.slane %v239_v0, 5  ;;  %v295_v50 = vrot.slane %v293_v34, 5  ;;  %v2985_v8 = vld [vmem:[%s2719_s24 + $0x18] sm:$0xf] }
  0x3a   : > { %v280_v48 = vor.u32 %v279_v41, %v276_v29  ;;  %v290_v49 = vor.u32 %v289_v47, %v285_v46  ;;  %v893_v25 = vshrl.u32 %v2962_v42, 16  ;;  %v896_v53 = vshll.u32 %v2962_v42, 16  ;;  %v2285_v0 = vld [vmem:[%s2719_s24 + $0x2c] sm:$0x1]  ;;  %v3006_v29 = vld [vmem:[%s2719_s24 + $0x5c] sm:$0x1] }
  0x3b   : > { %1444 = vrot.lane.b32.xlu0 %v2364_v39, %s2658_s30  ;;  %v705_v55 = vshrl.u32 %v2943_v5, 16  ;;  %v486_v58 = vsel %vm2774_vm2, %v2217_v12, %v485_v15  ;;  %v487_v20 = vrot.slane %v485_v15, 4  ;;  %v906_v17 = vshrl.u32 %v2969_v51, 16  ;;  %v237_v39 = vld [vmem:[%s2719_s24 + $0x58] sm:$0xf] }
  0x3c   : > { %1304 = vrot.lane.b32.xlu1 %v2338_v52, %s2658_s30  ;;  %v281_v57 = vrot.slane %v280_v48, 4  ;;  %v291_v61 = vrot.slane %v290_v49, 4  ;;  %v895_v63 = vrot.slane %v893_v25, 4  ;;  %v898_v2 = vrot.slane %v896_v53, 5  ;;  %v3010_v47 = vld [vmem:[%s2719_s24 + $0x64] sm:$0xf] }
  0x3d   : > { %v489_v3 = vsel %vm2774_vm2, %v487_v20, %v488_v54  ;;  %v1101_v56 = vrot.slane %v2969_v51, 5  ;;  %v708_v14 = vshll.u32 %v2943_v5, 16  ;;  %v2993_v27 = vrot.slane %v705_v55, 4  ;;  %v3015_v54 = vld [vmem:[%s2719_s24 + $0x68] sm:$0x1] }
  0x3e   : > { %v286_v37 = vsel %vm2882_vm5, %v281_v57, %v285_v46  ;;  %v296_v16 = vsel %vm2882_vm5, %v291_v61, %v295_v50  ;;  %v2325_v19 = vcombine.low %v486_v58, %v489_v3  ;;  %v2357_v32 = vcombine.low %v2962_v42, %v2969_v51  ;;  %v2257_v55 = vld [vmem:[%s2719_s24 + $0x60] sm:$0xe] }
  0x3f   : > { %v2317_v30 = vcombine.low %v286_v37, %v296_v16  ;;  %v1103_v31 = vrot.slane %v1101_v56, 4  ;;  %v585_v5 = vshrl.u32 %v2985_v8, 16  ;;  %v2333_v52 = vcombine.low %v2985_v8, %v2827_v7 }
  0x40   : > { %1246 = vrot.lane.b32.xlu1 %v2325_v19, %s2657_s27  ;;  %v899_v35 = vor.u32 %v898_v2, %v895_v63  ;;  %v902_v38 = vshll.u32 %v2969_v51, 16  ;;  %v908_v41 = vrot.slane %v906_v17, 4  ;;  %v912_v34 = vshll.u32 %v2285_v0, 16  ;;  %v448_v63 = vld [vmem:[%s2719_s24 + $0x54] sm:$0xe] }
  0x41   : > { %1206 = vrot.lane.b32.xlu0 %v2317_v30, %s2659_s19  ;;  %v1104_v42 = vrot.slane %v2285_v0, 5  ;;  %v418_v46 = vshrl.u32 %v236_v24, 16  ;;  %v3012_v12 = vrot.slane %v708_v14, 5  ;;  %v421_v15 = vshll.u32 %v236_v24, 16 }
  0x42   : > { %v900_v48 = vrot.slane %v899_v35, 4  ;;  %v904_v7 = vrot.slane %v902_v38, 5  ;;  %v588_v49 = vshll.u32 %v2985_v8, 16  ;;  %v427_v53 = vshll.u32 %v237_v39, 16 }
  0x43   : > { %v3020_v50 = vsel %vm2774_vm2, %v1103_v31, %v1104_v42  ;;  %v420_v25 = vrot.slane %v418_v46, 4  ;;  %v3023_v57 = vrot.slane %v585_v5, 4  ;;  %v914_v20 = vrot.slane %v912_v34, 5  ;;  %v2282_v5 = vld [vmem:[%s2719_s24 + $0x6c] sm:$0xf] }
  0x44   : > { %1294 = vrot.lane.b32.xlu1 %v2333_v52, %s2658_s30  ;;  %v909_v58 = vor.u32 %v908_v41, %v904_v7  ;;  %v423_v61 = vrot.slane %v421_v15, 5  ;;  %v905_v2 = vsel %vm2882_vm5, %v900_v48, %v904_v7  ;;  %v429_v37 = vrot.slane %v427_v53, 5  ;;  %v3040_v48 = vld [vmem:[%s2719_s24 + $0x70] sm:$0xf] }
  0x45   : > { %1406 = vrot.lane.b32.xlu0 %v2357_v32, %s2657_s27  ;;  %v431_v3 = vshrl.u32 %v237_v39, 16  ;;  %v437_v17 = vshll.u32 %v3006_v29, 16  ;;  %v2265_v16 = vrot.slane %v2257_v55, 9  ;;  %v835_v19 = vrot.slane %v3010_v47, 5  ;;  %3818 = vst [vmem:[#allocation5_spill] sm:$0xff] %v3040_v48 }
  0x46   : > { %v910_v8 = vrot.slane %v909_v58, 4  ;;  %v424_v14 = vor.u32 %v423_v61, %v420_v25  ;;  %v838_v30 = vrot.slane %v3015_v54, 5  ;;  %v2223_v31 = vrot.slane %v448_v63, 9 }
  0x47   : > { %v433_v0 = vrot.slane %v431_v3, 4  ;;  %v439_v24 = vrot.slane %v437_v17, 5  ;;  %v836_v35 = vsel %vm2774_vm2, %v2265_v16, %v835_v19  ;;  %v837_v38 = vrot.slane %v835_v19, 4  ;;  %v3054_v3 = vld [vmem:[%s2719_s24 + $0x28] sm:$0xf] }
  0x48   : > { %v915_v32 = vsel %vm2882_vm5, %v910_v8, %v914_v20  ;;  %v425_v52 = vrot.slane %v424_v14, 4  ;;  %v527_v42 = vrot.slane %v237_v39, 5  ;;  %v530_v46 = vrot.slane %v3006_v29, 5  ;;  %v3048_v20 = vld [vmem:[%s2719_s24 + $0x74] sm:$0x1] }
  0x49   : > { %v2365_v41 = vcombine.low %v905_v2, %v915_v32  ;;  %v434_v34 = vor.u32 %v433_v0, %v429_v37  ;;  %v590_v7 = vrot.slane %v588_v49, 5  ;;  %v839_v15 = vsel %vm2774_vm2, %v837_v38, %v838_v30  ;;  %3819 = vst [vmem:[#allocation6_spill] sm:$0xff] %v3048_v20  ;;  %v3064_v16 = vld [vmem:[%s2719_s24 + $0x2c] sm:$0x1]  ;;  %v2252_v19 = vld [vmem:[%s2719_s24 + $0x24] sm:$0xe] }
  0x4a   : > { %v1037_v25 = vshrl.u32 %v2282_v5, 16  ;;  %v1040_v53 = vshll.u32 %v2282_v5, 16  ;;  %v430_v55 = vsel %vm2882_vm5, %v425_v52, %v429_v37  ;;  %v2355_v58 = vcombine.low %v836_v35, %v839_v15  ;;  %v3068_v0 = vld [vmem:[%s2719_s24 + $0x24] sm:$0xe] }
  0x4b   : > { %1446 = vrot.lane.b32.xlu0 %v2365_v41, %s2658_s30  ;;  %v435_v39 = vrot.slane %v434_v34, 4  ;;  %v529_v29 = vrot.slane %v527_v42, 4  ;;  %v528_v49 = vsel %vm2774_vm2, %v2223_v31, %v527_v42  ;;  %v1050_v2 = vshrl.u32 %v3040_v48, 16  ;;  %v3078_v42 = vld [vmem:[%s2719_s24 + $0x60] sm:$0xf] }
  0x4c   : > { %v1039_v61 = vrot.slane %v1037_v25, 4  ;;  %v1042_v63 = vrot.slane %v1040_v53, 5  ;;  %v711_v17 = vor.u32 %v3012_v12, %v2993_v27  ;;  %v1046_v14 = vshll.u32 %v3040_v48, 16  ;;  %v227_v53 = vld [vmem:[%s2719_s24 + $0x1c] sm:$0xf] }
  0x4d   : > { %v440_v37 = vsel %vm2882_vm5, %v435_v39, %v439_v24  ;;  %v531_v8 = vsel %vm2774_vm2, %v529_v29, %v530_v46  ;;  %v591_v30 = vor.u32 %v590_v7, %v3023_v57  ;;  %v1052_v27 = vrot.slane %v1050_v2, 4  ;;  %v226_v46 = vld [vmem:[%s2719_s24 + $0x18] sm:$0xf] }
  0x4e   : > { %v2323_v31 = vcombine.low %v430_v55, %v440_v37  ;;  %v1043_v32 = vor.u32 %v1042_v63, %v1039_v61  ;;  %v2331_v12 = vcombine.low %v528_v49, %v531_v8  ;;  %v2363_v24 = vcombine.low %v2282_v5, %v3040_v48  ;;  %v240_v49 = vld [vmem:[%s2719_s24 + $0x20] sm:$0x1]  ;;  %v443_v8 = vld [vmem:[%s2719_s24 + $0x18] sm:$0xe]  ;;  %v3262_v48 = vld [vmem:[%s2719_s24 + $0x4c] sm:$0xf] }
  0x4f   : > { %1370 = vrot.lane.b32.xlu0 %v2355_v58, %s2659_s19  ;;  %v1048_v52 = vrot.slane %v1046_v14, 5  ;;  %v1056_v35 = vshll.u32 %v3048_v20, 16  ;;  %v2260_v41 = vrot.slane %v2252_v19, 9  ;;  %v800_v34 = vrot.slane %v3054_v3, 5  ;;  %v3094_v61 = vld [vmem:[%s3794_s1 + $0x80] sm:$0xff]  }
  0x50   : > { %1218 = vrot.lane.b32.xlu1 %v2323_v31, %s2659_s19  ;;  %v1044_v38 = vrot.slane %v1043_v32, 4  ;;  %v803_v57 = vrot.slane %v3064_v16, 5  ;;  %v3081_v7 = vrot.slane %v711_v17, 4  ;;  %v2301_v5 = vrot.slane %v3068_v0, 9  ;;  %3820 = vst [vmem:[#allocation7_spill] sm:$0xff] %v3094_v61  ;;  %2483 = vmatprep.subr.bf16.mxu1 %v3094_v61 }
  0x51   : > { %v1053_v15 = vor.u32 %v1052_v27, %v1048_v52  ;;  %v1058_v25 = vrot.slane %v1056_v35, 5  ;;  %v3085_v55 = vrot.slane %v591_v30, 4  ;;  %v801_v58 = vsel %vm2774_vm2, %v2260_v41, %v800_v34  ;;  %v3105_v31 = vld [vmem:[%s2719_s24 + $0x30] sm:$0xf]  ;;  %v3112_v35 = vld [vmem:[%s2719_s24 + $0x34] sm:$0xf] }
  0x52   : > { %v802_v29 = vrot.slane %v800_v34, 4  ;;  %v1049_v63 = vsel %vm2882_vm5, %v1044_v38, %v1048_v52  ;;  %v729_v17 = vshrl.u32 %v3078_v42, 16  ;;  %v298_v37 = vshrl.u32 %v226_v46, 16 }
  0x53   : > { %1418 = vrot.lane.b32.xlu0 %v2363_v24, %s2657_s27  ;;  %v1054_v2 = vrot.slane %v1053_v15, 4  ;;  %v301_v19 = vshll.u32 %v226_v46, 16  ;;  %v307_v0 = vshll.u32 %v227_v53, 16  ;;  %v311_v30 = vshrl.u32 %v227_v53, 16 }
  0x54   : > { %1258 = vrot.lane.b32.xlu1 %v2331_v12, %s2657_s27  ;;  %v804_v14 = vsel %vm2774_vm2, %v802_v29, %v803_v57  ;;  %v732_v24 = vshll.u32 %v3078_v42, 16  ;;  %v300_v52 = vrot.slane %v298_v37, 4  ;;  %v2339_v57 = vcombine.low %v3078_v42, %v3010_v47  ;;  %v2230_v42 = vld [vmem:[%s2719_s24 + $0x24] sm:$0xf] }
  0x55   : > { %v1059_v32 = vsel %vm2882_vm5, %v1054_v2, %v1058_v25  ;;  %v2350_v27 = vcombine.low %v801_v58, %v804_v14  ;;  %v303_v38 = vrot.slane %v301_v19, 5  ;;  %v309_v41 = vrot.slane %v307_v0, 5 }
  0x56   : > { %v2371_v12 = vcombine.low %v1049_v63, %v1059_v32  ;;  %v313_v34 = vrot.slane %v311_v30, 4  ;;  %v317_v46 = vshll.u32 %v240_v49, 16  ;;  %v2218_v15 = vrot.slane %v443_v8, 9  ;;  %v3124_v30 = vld [vmem:[%s2719_s24 + $0x38] sm:$0x1] }
  0x57   : > { %1360 = vrot.lane.b32.xlu0 %v2350_v27, %s2659_s19  ;;  %v492_v25 = vrot.slane %v227_v53, 5  ;;  %v304_v58 = vor.u32 %v303_v38, %v300_v52  ;;  %v495_v2 = vrot.slane %v240_v49, 5  ;;  %v917_v63 = vshrl.u32 %v3105_v31, 16  ;;  %v3128_v49 = vld [vmem:[%s2719_s24 + $0x24] sm:$0xf] }
  0x58   : > { %1458 = vrot.lane.b32.xlu1 %v2371_v12, %s2658_s30  ;;  %v314_v29 = vor.u32 %v313_v34, %v309_v41  ;;  %v319_v37 = vrot.slane %v317_v46, 5  ;;  %v920_v0 = vshll.u32 %v3105_v31, 16  ;;  %v930_v27 = vshrl.u32 %v3112_v35, 16  ;;  %v3140_v46 = vld [vmem:[%s2719_s24 + $0x28] sm:$0xf] }
  0x59   : > { %v493_v14 = vsel %vm2774_vm2, %v2218_v15, %v492_v25  ;;  %v494_v19 = vrot.slane %v492_v25, 4  ;;  %v305_v53 = vrot.slane %v304_v58, 4  ;;  %v919_v32 = vrot.slane %v917_v63, 4 }
  0x5a   : > { %v315_v8 = vrot.slane %v314_v29, 4  ;;  %v3134_v52 = vsel %vm2774_vm2, %v2301_v5, %v1101_v56  ;;  %v922_v34 = vrot.slane %v920_v0, 5  ;;  %v609_v56 = vshrl.u32 %v2230_v42, 16  ;;  %v3148_v5 = vld [vmem:[%s2719_s24 + $0x2c] sm:$0x1] }
  0x5b   : > { %v496_v38 = vsel %vm2774_vm2, %v494_v19, %v495_v2  ;;  %v310_v15 = vsel %vm2882_vm5, %v305_v53, %v309_v41  ;;  %v3150_v58 = vrot.slane %v729_v17, 4  ;;  %v3152_v29 = vrot.slane %v732_v24, 5  ;;  %v3162_v53 = vld [vmem:[%s2719_s24 + $0x34] sm:$0xf] }
  0x5c   : > { %1306 = vrot.lane.b32.xlu1 %v2339_v57, %s2658_s30  ;;  %v320_v51 = vsel %vm2882_vm5, %v315_v8, %v319_v37  ;;  %v2326_v25 = vcombine.low %v493_v14, %v496_v38  ;;  %v923_v63 = vor.u32 %v922_v34, %v919_v32  ;;  %v2358_v57 = vcombine.low %v3105_v31, %v3112_v35  ;;  %v2253_v8 = vld [vmem:[%s2719_s24 + $0x30] sm:$0xe]  ;;  %v3171_v34 = vld [vmem:[%s2719_s24 + $0x38] sm:$0x1] }
  0x5d   : > { %v2318_v2 = vcombine.low %v310_v15, %v320_v51  ;;  %v926_v41 = vshll.u32 %v3112_v35, 16  ;;  %v932_v37 = vrot.slane %v930_v27, 4  ;;  %v936_v14 = vshll.u32 %v3124_v30, 16  ;;  %v444_v15 = vld [vmem:[%s2719_s24 + $0x24] sm:$0xe] }
  0x5e   : > { %v612_v19 = vshll.u32 %v2230_v42, 16  ;;  %v2334_v17 = vcombine.low %v2230_v42, %v3054_v3  ;;  %v924_v0 = vrot.slane %v923_v63, 4  ;;  %v322_v24 = vshrl.u32 %v3128_v49, 16 }
  0x5f   : > { %1208 = vrot.lane.b32.xlu0 %v2318_v2, %s2659_s19  ;;  %v3166_v31 = vrot.slane %v609_v56, 4  ;;  %v928_v32 = vrot.slane %v926_v41, 5  ;;  %v325_v27 = vshll.u32 %v3128_v49, 16  ;;  %v331_v38 = vshll.u32 %v3140_v46, 16 }
  0x60   : > { %1248 = vrot.lane.b32.xlu1 %v2326_v25, %s2657_s27  ;;  %v938_v51 = vrot.slane %v936_v14, 5  ;;  %v324_v42 = vrot.slane %v322_v24, 4  ;;  %v335_v2 = vshrl.u32 %v3140_v46, 16  ;;  %v341_v63 = vshll.u32 %v3148_v5, 16 }
  0x61   : > { %v735_v13 = vor.u32 %v3152_v29, %v3150_v58  ;;  %v933_v25 = vor.u32 %v932_v37, %v928_v32  ;;  %v327_v56 = vrot.slane %v325_v27, 5  ;;  %v333_v41 = vrot.slane %v331_v38, 5 }
  0x62   : > { %v3179_v12 = vrot.slane %v612_v19, 5  ;;  %v929_v60 = vsel %vm2882_vm5, %v924_v0, %v928_v32  ;;  %v337_v14 = vrot.slane %v335_v2, 4  ;;  %v343_v24 = vrot.slane %v341_v63, 5  ;;  %v2274_v19 = vld [vmem:[%s2719_s24 + $0x3c] sm:$0xf] }
  0x63   : > { %1408 = vrot.lane.b32.xlu0 %v2358_v57, %s2657_s27  ;;  %v934_v4 = vrot.slane %v933_v25, 4  ;;  %v328_v9 = vor.u32 %v327_v56, %v324_v42  ;;  %v2261_v39 = vrot.slane %v2253_v8, 9  ;;  %v807_v58 = vrot.slane %v3162_v53, 5  ;;  %v3193_v2 = vld [vmem:[%s2719_s24 + $0x40] sm:$0xf] }
  0x64   : > { %1296 = vrot.lane.b32.xlu1 %v2334_v17, %s2658_s30  ;;  %v338_v29 = vor.u32 %v337_v14, %v333_v41  ;;  %v810_v37 = vrot.slane %v3171_v34, 5  ;;  %v2219_v27 = vrot.slane %v444_v15, 9  ;;  %v499_v57 = vrot.slane %v3140_v46, 5 }
  0x65   : > { %v939_v0 = vsel %vm2882_vm5, %v934_v4, %v938_v51  ;;  %v329_v32 = vrot.slane %v328_v9, 4  ;;  %v808_v38 = vsel %vm2774_vm2, %v2261_v39, %v807_v58  ;;  %v809_v17 = vrot.slane %v807_v58, 4 }
  0x66   : > { %v2366_v8 = vcombine.low %v929_v60, %v939_v0  ;;  %v339_v42 = vrot.slane %v338_v29, 4  ;;  %v500_v63 = vsel %vm2774_vm2, %v2219_v27, %v499_v57  ;;  %v501_v15 = vrot.slane %v499_v57, 4 }
  0x67   : > { %v334_v25 = vsel %vm2882_vm5, %v329_v32, %v333_v41  ;;  %v811_v4 = vsel %vm2774_vm2, %v809_v17, %v810_v37  ;;  %v502_v9 = vrot.slane %v3148_v5, 5  ;;  %v941_v39 = vshrl.u32 %v2274_v19, 16  ;;  %v3210_v37 = vld [vmem:[%s2719_s24 + $0x44] sm:$0x1]  ;;  %v3217_v32 = vld [vmem:[%s2719_s24 + $0x30] sm:$0xf] }
  0x68   : > { %1448 = vrot.lane.b32.xlu0 %v2366_v8, %s2658_s30  ;;  %v344_v60 = vsel %vm2882_vm5, %v339_v42, %v343_v24  ;;  %v2351_v51 = vcombine.low %v808_v38, %v811_v4  ;;  %v944_v56 = vshll.u32 %v2274_v19, 16  ;;  %v954_v14 = vshrl.u32 %v3193_v2, 16  ;;  %3821 = vst [vmem:[#allocation8_spill] sm:$0xff] %v3217_v32  ;;  %v2232_v8 = vld [vmem:[%s2719_s24 + $0x30] sm:$0xf] }
  0x69   : > { %v2319_v41 = vcombine.low %v334_v25, %v344_v60  ;;  %v503_v29 = vsel %vm2774_vm2, %v501_v15, %v502_v9  ;;  %v943_v5 = vrot.slane %v941_v39, 4  ;;  %v3213_v57 = vrot.slane %v735_v13, 4  ;;  %v3225_v25 = vld [vmem:[%s2719_s24 + $0x34] sm:$0xf]  ;;  %v3231_v60 = vld [vmem:[%s2719_s24 + $0x38] sm:$0x1] }
  0x6a   : > { %v946_v0 = vrot.slane %v944_v56, 5  ;;  %v2327_v17 = vcombine.low %v500_v63, %v503_v29  ;;  %v950_v42 = vshll.u32 %v3193_v2, 16  ;;  %v956_v15 = vrot.slane %v954_v14, 4  ;;  %v3236_v29 = vld [vmem:[%s2719_s24 + $0x40] sm:$0xf] }
  0x6b   : > { %1210 = vrot.lane.b32.xlu1 %v2319_v41, %s2659_s19  ;;  %v2359_v13 = vcombine.low %v2274_v19, %v3193_v2  ;;  %v633_v4 = vshrl.u32 %v2232_v8, 16  ;;  %v960_v39 = vshll.u32 %v3210_v37, 16  ;;  %v636_v56 = vshll.u32 %v2232_v8, 16  ;;  %3822 = vst [vmem:[#allocation9_spill] sm:$0xff] %v3236_v29  ;;  %v445_v38 = vld [vmem:[%s2719_s24 + $0x30] sm:$0xe] }
  0x6c   : > { %1362 = vrot.lane.b32.xlu0 %v2351_v51, %s2659_s19  ;;  %v947_v9 = vor.u32 %v946_v0, %v943_v5  ;;  %v952_v63 = vrot.slane %v950_v42, 5  ;;  %v346_v41 = vshrl.u32 %v3217_v32, 16  ;;  %v349_v14 = vshll.u32 %v3217_v32, 16  ;;  %v3242_v0 = vld [vmem:[%s2719_s24 + $0x44] sm:$0x1] }
  0x6d   : > { %v2335_v58 = vcombine.low %v2232_v8, %v3162_v53  ;;  %v355_v19 = vshll.u32 %v3225_v25, 16  ;;  %v359_v5 = vshrl.u32 %v3225_v25, 16  ;;  %v962_v42 = vrot.slane %v960_v39, 5 }
  0x6e   : > { %v948_v51 = vrot.slane %v947_v9, 4  ;;  %v957_v24 = vor.u32 %v956_v15, %v952_v63  ;;  %v348_v27 = vrot.slane %v346_v41, 4  ;;  %v351_v40 = vrot.slane %v349_v14, 5 }
  0x6f   : > { %1250 = vrot.lane.b32.xlu1 %v2327_v17, %s2657_s27  ;;  %v3247_v59 = vrot.slane %v633_v4, 4  ;;  %v357_v8 = vrot.slane %v355_v19, 5  ;;  %v361_v9 = vrot.slane %v359_v5, 4  ;;  %v365_v36 = vshll.u32 %v3231_v60, 16  ;;  %v2276_v4 = vld [vmem:[%s2719_s24 + $0x48] sm:$0xf] }
  0x70   : > { %1410 = vrot.lane.b32.xlu0 %v2359_v13, %s2657_s27  ;;  %v3251_v61 = vrot.slane %v636_v56, 5  ;;  %v953_v17 = vsel %vm2882_vm5, %v948_v51, %v952_v63  ;;  %v958_v15 = vrot.slane %v957_v24, 4  ;;  %v352_v39 = vor.u32 %v351_v40, %v348_v27 }
  0x71   : > { %v362_v41 = vor.u32 %v361_v9, %v357_v8  ;;  %v367_v14 = vrot.slane %v365_v36, 5  ;;  %v2262_v20 = vrot.slane %v2254_v22, 9  ;;  %v814_v13 = vrot.slane %v3236_v29, 5 }
  0x72   : > { %v963_v19 = vsel %vm2882_vm5, %v958_v15, %v962_v42  ;;  %v353_v5 = vrot.slane %v352_v39, 4  ;;  %v817_v56 = vrot.slane %v3242_v0, 5  ;;  %v2220_v6 = vrot.slane %v445_v38, 9  ;;  %v2234_v39 = vld [vmem:[%s2719_s24 + $0x3c] sm:$0xf] }
  0x73   : > { %1298 = vrot.lane.b32.xlu1 %v2335_v58, %s2658_s30  ;;  %v2367_v63 = vcombine.low %v953_v17, %v963_v19  ;;  %v363_v24 = vrot.slane %v362_v41, 4  ;;  %v815_v36 = vsel %vm2774_vm2, %v2262_v20, %v814_v13  ;;  %v816_v22 = vrot.slane %v814_v13, 4 }
  0x74   : > { %v358_v40 = vsel %vm2882_vm5, %v353_v5, %v357_v8  ;;  %v506_v58 = vrot.slane %v3225_v25, 5  ;;  %v509_v27 = vrot.slane %v3231_v60, 5  ;;  %v965_v51 = vshrl.u32 %v2276_v4, 16 }
  0x75   : > { %1450 = vrot.lane.b32.xlu0 %v2367_v63, %s2658_s30  ;;  %v368_v38 = vsel %vm2882_vm5, %v363_v24, %v367_v14  ;;  %v818_v42 = vsel %vm2774_vm2, %v816_v22, %v817_v56  ;;  %v968_v9 = vshll.u32 %v2276_v4, 16  ;;  %v978_v20 = vshrl.u32 %v3262_v48, 16  ;;  %v3286_v56 = vld [vmem:[%s2719_s24 + $0x50] sm:$0x1] }
  0x76   : > { %v2320_v17 = vcombine.low %v358_v40, %v368_v38  ;;  %v2352_v8 = vcombine.low %v815_v36, %v818_v42  ;;  %v507_v15 = vsel %vm2774_vm2, %v2220_v6, %v506_v58  ;;  %v508_v60 = vrot.slane %v506_v58, 4  ;;  %v3320_v38 = vld [vmem:[%s2719_s24 + $0x50] sm:$0x1] }
  0x77   : > { %v3823_v41 = vor.u32 %v3179_v12, %v3166_v31  ;;  %v967_v19 = vrot.slane %v965_v51, 4  ;;  %v970_v5 = vrot.slane %v968_v9, 5  ;;  %v2360_v24 = vcombine.low %v2276_v4, %v3262_v48  ;;  %v3294_v31 = vld [vmem:[%s2719_s24 + $0x3c] sm:$0xf]  ;;  %v3299_v51 = vld [vmem:[%s2719_s24 + $0x40] sm:$0xf] }
  0x78   : > { %1212 = vrot.lane.b32.xlu1 %v2320_v17, %s2659_s19  ;;  %v510_v6 = vsel %vm2774_vm2, %v508_v60, %v509_v27  ;;  %v657_v12 = vshrl.u32 %v2234_v39, 16  ;;  %3824 = vst [vmem:[#allocation10_spill] sm:$0xff] %v3294_v31  ;;  %v974_v40 = vshll.u32 %v3262_v48, 16  ;;  %v980_v58 = vrot.slane %v978_v20, 4  ;;  %v243_v9 = vld [vmem:[%s2719_s24 + $0x44] sm:$0x1] }
  0x79   : > { %v3282_v13 = vrot.slane %v3823_v41, 4  ;;  %1364 = vrot.lane.b32.xlu0 %v2352_v8, %s2659_s19  ;;  %v2328_v36 = vcombine.low %v507_v15, %v510_v6  ;;  %v971_v22 = vor.u32 %v970_v5, %v967_v19  ;;  %v639_v27 = vor.u32 %v3251_v61, %v3247_v59  ;;  %v3309_v20 = vld [vmem:[%s2719_s24 + $0x4c] sm:$0xf]  ;;  %v2255_v5 = vld [vmem:[%s2719_s24 + $0x48] sm:$0xe] }
  0x7a   : > { %v660_v4 = vshll.u32 %v2234_v39, 16  ;;  %v984_v42 = vshll.u32 %v3286_v56, 16  ;;  %v976_v8 = vrot.slane %v974_v40, 5  ;;  %v370_v15 = vshrl.u32 %v3294_v31, 16 }
  0x7b   : > { %v972_v17 = vrot.slane %v971_v22, 4  ;;  %v373_v60 = vshll.u32 %v3294_v31, 16  ;;  %v3312_v41 = vrot.slane %v657_v12, 4  ;;  %v2336_v59 = vcombine.low %v2234_v39, %v3236_v29  ;;  %v446_v39 = vld [vmem:[%s2719_s24 + $0x3c] sm:$0xe] }
  0x7c   : > { %1252 = vrot.lane.b32.xlu1 %v2328_v36, %s2657_s27  ;;  %v379_v61 = vshll.u32 %v3299_v51, 16  ;;  %v383_v19 = vshrl.u32 %v3299_v51, 16  ;;  %v981_v6 = vor.u32 %v980_v58, %v976_v8  ;;  %v986_v22 = vrot.slane %v984_v42, 5 }
  0x7d   : > { %1412 = vrot.lane.b32.xlu0 %v2360_v24, %s2657_s27  ;;  %v372_v40 = vrot.slane %v370_v15, 4  ;;  %v375_v14 = vrot.slane %v373_v60, 5  ;;  %v3322_v63 = vrot.slane %v660_v4, 5  ;;  %v389_v31 = vshll.u32 %v243_v9, 16 }
  0x7e   : > { %v381_v36 = vrot.slane %v379_v61, 5  ;;  %v385_v12 = vrot.slane %v383_v19, 4  ;;  %v977_v26 = vsel %vm2882_vm5, %v972_v17, %v976_v8  ;;  %v982_v10 = vrot.slane %v981_v6, 4  ;;  %v2278_v17 = vld [vmem:[%s2719_s24 + $0x54] sm:$0xf] }
  0x7f   : > { %v376_v29 = vor.u32 %v375_v14, %v372_v40  ;;  %v2263_v24 = vrot.slane %v2255_v5, 9  ;;  %v391_v42 = vrot.slane %v389_v31, 5  ;;  %v821_v15 = vrot.slane %v3309_v20, 5  ;;  %v3337_v31 = vld [vmem:[%s2719_s24 + $0x58] sm:$0xf] }
  0x80   : > { %1300 = vrot.lane.b32.xlu1 %v2336_v59, %s2658_s30  ;;  %v386_v58 = vor.u32 %v385_v12, %v381_v36  ;;  %v824_v4 = vrot.slane %v3320_v38, 5  ;;  %v987_v60 = vsel %vm2882_vm5, %v982_v10, %v986_v22  ;;  %v2221_v19 = vrot.slane %v446_v39, 9 }
  0x81   : > { %v377_v61 = vrot.slane %v376_v29, 4  ;;  %v513_v32 = vrot.slane %v3299_v51, 5  ;;  %v2368_v8 = vcombine.low %v977_v26, %v987_v60  ;;  %v822_v5 = vsel %vm2774_vm2, %v2263_v24, %v821_v15 }
  0x82   : > { %v387_v14 = vrot.slane %v386_v58, 4  ;;  %v823_v59 = vrot.slane %v821_v15, 4  ;;  %v516_v22 = vrot.slane %v243_v9, 5  ;;  %v989_v12 = vshrl.u32 %v2278_v17, 16 }
  0x83   : > { %v382_v6 = vsel %vm2882_vm5, %v377_v61, %v381_v36  ;;  %v514_v10 = vsel %vm2774_vm2, %v2221_v19, %v513_v32  ;;  %v515_v29 = vrot.slane %v513_v32, 4  ;;  %1452 = vrot.lane.b32.xlu0 %v2368_v8, %s2658_s30  ;;  %v992_v39 = vshll.u32 %v2278_v17, 16  ;;  %v3352_v32 = vld [vmem:[%s2719_s24 + $0x5c] sm:$0x1]  ;;  %v2236_v19 = vld [vmem:[%s2719_s24 + $0x48] sm:$0xf] }
  0x84   : > { %v392_v26 = vsel %vm2882_vm5, %v387_v14, %v391_v42  ;;  %v825_v40 = vsel %vm2774_vm2, %v823_v59, %v824_v4  ;;  %v1002_v15 = vshrl.u32 %v3337_v31, 16  ;;  %v3354_v9 = vrot.slane %v639_v27, 4 }
  0x85   : > { %v2321_v24 = vcombine.low %v382_v6, %v392_v26  ;;  %v2353_v58 = vcombine.low %v822_v5, %v825_v40  ;;  %v517_v36 = vsel %vm2774_vm2, %v515_v29, %v516_v22  ;;  %v991_v61 = vrot.slane %v989_v12, 4 }
  0x86   : > { %v994_v42 = vrot.slane %v992_v39, 5  ;;  %v2329_v4 = vcombine.low %v514_v10, %v517_v36  ;;  %v2361_v8 = vcombine.low %v2278_v17, %v3337_v31  ;;  %v681_v14 = vshrl.u32 %v2236_v19, 16 }
  0x87   : > { %1214 = vrot.lane.b32.xlu1 %v2321_v24, %s2659_s19  ;;  %v684_v5 = vshll.u32 %v2236_v19, 16  ;;  %1366 = vrot.lane.b32.xlu0 %v2353_v58, %s2659_s19  ;;  %v998_v6 = vshll.u32 %v3337_v31, 16  ;;  %v1004_v27 = vrot.slane %v1002_v15, 4  ;;  %v1008_v29 = vshll.u32 %v3352_v32, 16 }
  0x88   : > { %v995_v59 = vor.u32 %v994_v42, %v991_v61  ;;  %v663_v10 = vor.u32 %v3322_v63, %v3312_v41  ;;  %v683_v40 = vrot.slane %v681_v14, 4  ;;  %v2337_v12 = vcombine.low %v2236_v19, %v3309_v20  ;;  %v2605_v42 = vld [vmem:[%s2719_s24 + $0x58] sm:$0xf] }
  0x89   : > { %v1000_v24 = vrot.slane %v998_v6, 5  ;;  %v686_v58 = vrot.slane %v684_v5, 5  ;;  %v3825_v15 = vshll.u32 %v2755_v23, 16  ;;  %v714_v22 = vshll.u32 %v2605_v42, 16 }
  0x8a   : > { %v996_v39 = vrot.slane %v995_v59, 4  ;;  %v718_v26 = vshrl.u32 %v2605_v42, 16  ;;  %v1010_v41 = vrot.slane %v1008_v29, 5  ;;  %v3826_v14 = vshll.u32 %v2767_v28, 16  ;;  %v2606_v59 = vld [vmem:[%s2719_s24 + $0x1c] sm:$0xf] }
  0x8b   : > { %1254 = vrot.lane.b32.xlu1 %v2329_v4, %s2657_s27  ;;  %v572_v61 = vrot.slane %v3825_v15, 5  ;;  %1414 = vrot.lane.b32.xlu0 %v2361_v8, %s2657_s27  ;;  %v1005_v63 = vor.u32 %v1004_v27, %v1000_v24  ;;  %v594_v6 = vshll.u32 %v2606_v59, 16  ;;  %v716_v15 = vrot.slane %v714_v22, 5 }
  0x8c   : > { %v3370_v36 = vpop.permute.xlu1 %1404  ;;  %v582_v19 = vrot.slane %v3826_v14, 5  ;;  %v1001_v4 = vsel %vm2882_vm5, %v996_v39, %v1000_v24  ;;  %v720_v8 = vrot.slane %v718_v26, 4  ;;  %v598_v29 = vshrl.u32 %v2606_v59, 16 }
  0x8d   : > { %v573_v23 = vsel %vm2882_vm5, %v2964_v43, %v572_v61  ;;  %v577_v5 = vor.u32 %v2925_v11, %v572_v61  ;;  %v1006_v42 = vrot.slane %v1005_v63, 4  ;;  %v596_v27 = vrot.slane %v594_v6, 5 }
  0x8e   : > { %v3385_v17 = vpop.permute.xlu0 %1416  ;;  %v3387_v28 = vrot.slane %v663_v10, 4  ;;  %v1129_v60 = vrot.slane %v3337_v31, 5  ;;  %v721_v11 = vor.u32 %v720_v8, %v716_v15  ;;  %v3827_v22 = vshll.u32 %v2792_v44, 16  ;;  %v3846_v31 = vld [vmem:[#allocation4_spill] sm:$0xff] }
  0x8f   : > { %1302 = vrot.lane.b32.xlu1 %v2337_v12, %s2658_s30  ;;  %v578_v39 = vrot.slane %v577_v5, 4  ;;  %v1011_v43 = vsel %vm2882_vm5, %v1006_v42, %v1010_v41  ;;  %v600_v61 = vrot.slane %v598_v29, 4  ;;  %v687_v26 = vor.u32 %v686_v58, %v683_v40 }
  0x90   : > { %v726_v24 = vrot.slane %v3827_v22, 5  ;;  %v2369_v63 = vcombine.low %v1001_v4, %v1011_v43  ;;  %v3396_v59 = vpop.permute.xlu1 %1292  ;;  %v717_v12 = vsel %vm2882_vm5, %v3081_v7, %v716_v15  ;;  %v722_v5 = vrot.slane %v721_v11, 4  ;;  %v2292_v43 = vld [vmem:[%s2719_s24 + $0x18] sm:$0xe]  ;;  %v3421_v11 = vld [vmem:[%s2719_s24 + $0x4c] sm:$0xf] }
  0x91   : > { %v583_v10 = vsel %vm2882_vm5, %v578_v39, %v582_v19  ;;  %v601_v14 = vor.u32 %v600_v61, %v596_v27  ;;  %v3828_v41 = vshll.u32 %v2838_v18, 16  ;;  %v1132_v42 = vrot.slane %v3352_v32, 5  ;;  %v3424_v22 = vld [vmem:[%s2719_s24 + $0x48] sm:$0xf] }
  0x92   : > { %v2340_v6 = vcombine.low %v573_v23, %v583_v10  ;;  %1454 = vrot.lane.b32.xlu0 %v2369_v63, %s2658_s30  ;;  %v738_v40 = vshll.u32 %v3010_v47, 16  ;;  %v742_v58 = vshrl.u32 %v3010_v47, 16  ;;  %v727_v7 = vsel %vm2882_vm5, %v722_v5, %v726_v24  ;;  %v3437_v63 = vld [vmem:[%s2719_s24] sm:$0xf] }
  0x93   : > { %v606_v44 = vrot.slane %v3828_v41, 5  ;;  %v597_v18 = vsel %vm2882_vm5, %v3085_v55, %v596_v27  ;;  %v602_v4 = vrot.slane %v601_v14, 4  ;;  %v618_v23 = vshll.u32 %v3054_v3, 16 }
  0x94   : > { %v3415_v15 = vrot.slane %v687_v26, 4  ;;  %v2346_v8 = vcombine.low %v717_v12, %v727_v7  ;;  %v740_v29 = vrot.slane %v738_v40, 5  ;;  %v744_v39 = vrot.slane %v742_v58, 4  ;;  %v3434_v26 = vld [vmem:[%s2719_s24 + $0x4] sm:$0xf] }
  0x95   : > { %v607_v47 = vsel %vm2882_vm5, %v602_v4, %v606_v44  ;;  %v2314_v55 = vcombine.low %v3424_v22, %v3421_v11  ;;  %v620_v27 = vrot.slane %v618_v23, 5  ;;  %v622_v14 = vshrl.u32 %v3054_v3, 16 }
  0x96   : > { %v3431_v61 = vcombine.low %v597_v18, %v607_v47  ;;  %v2308_v10 = vcombine.low %v3437_v63, %v3434_v26  ;;  %v745_v12 = vor.u32 %v744_v39, %v740_v29  ;;  %v3829_v5 = vshll.u32 %v3015_v54, 16  ;;  %v3853_v26 = vld [vmem:[#allocation10_spill] sm:$0xff] }
  0x97   : > { %v1357_v19 = vpop.permute.xlu0 %1356  ;;  %v741_v3 = vsel %vm2882_vm5, %v3213_v57, %v740_v29  ;;  %v624_v40 = vrot.slane %v622_v14, 4  ;;  %v2300_v58 = vrot.slane %v2292_v43, 9  ;;  %v3830_v4 = vshll.u32 %v3064_v16, 16  ;;  %v2294_v57 = vld [vmem:[%s2719_s24 + $0x30] sm:$0xe] }
  0x98   : > { %v750_v41 = vrot.slane %v3829_v5, 5  ;;  %v3444_v44 = vsel %vm1484_vm6, %v2340_v6, %v1357_v19  ;;  %v746_v18 = vrot.slane %v745_v12, 4  ;;  %v3831_v39 = vrot.slane %v2903_v45, 5 }
  0x99   : > { %v3429_v24 = vpop.permute.xlu1 %1244  ;;  %v630_v23 = vrot.slane %v3830_v4, 5  ;;  %v2373_v6 = vcombine.low %v3134_v52, %v3020_v50  ;;  %v621_v19 = vsel %vm2882_vm5, %v3282_v13, %v620_v27  ;;  %v625_v29 = vor.u32 %v624_v40, %v620_v27  ;;  %v2295_v27 = vld [vmem:[%s2719_s24 + $0x3c] sm:$0xe] }
  0x9a   : > { %v3456_v54 = vsel %vm2774_vm2, %v2751_v21, %v3831_v39  ;;  %v3832_v43 = vrot.slane %v2723_v1, 5  ;;  %v751_v21 = vsel %vm2882_vm5, %v746_v18, %v750_v41  ;;  %v642_v14 = vshll.u32 %v3162_v53, 16 }
  0x9b   : > { %v1369_v7 = vpop.permute.xlu0 %1368  ;;  %v646_v13 = vshrl.u32 %v3162_v53, 16  ;;  %v3480_v12 = vcombine.low %v741_v3, %v751_v21  ;;  %v626_v5 = vrot.slane %v625_v29, 4  ;;  %v2302_v40 = vrot.slane %v2294_v57, 9  ;;  %v2296_v21 = vld [vmem:[%s2719_s24 + $0x48] sm:$0xe] }
  0x9c   : > { %v3468_v16 = vsel %vm2774_vm2, %v2300_v58, %v3832_v43  ;;  %v1571_v1 = vsel %vm1484_vm6, %v2346_v8, %v1369_v7  ;;  %v644_v41 = vrot.slane %v642_v14, 5  ;;  %v3833_v4 = vshll.u32 %v3171_v34, 16 }
  0x9d   : > { %v2372_v47 = vcombine.low %v3468_v16, %v3456_v54  ;;  %v3482_v58 = vpop.permute.xlu1 %1256  ;;  %v648_v18 = vrot.slane %v646_v13, 4  ;;  %v3834_v43 = vrot.slane %v3112_v35, 5  ;;  %v631_v45 = vsel %vm2882_vm5, %v626_v5, %v630_v23  ;;  %v2297_v5 = vld [vmem:[%s2719_s24 + $0x54] sm:$0xe] }
  0x9e   : > { %v654_v39 = vrot.slane %v3833_v4, 5  ;;  %v2303_v7 = vrot.slane %v2295_v27, 9  ;;  %v3836_v57 = vrot.slane %v3193_v2, 5  ;;  %v3499_v14 = vcombine.low %v621_v19, %v631_v45 }
  0x9f   : > { %v1110_v53 = vrot.slane %v3834_v43, 4  ;;  %v3835_v8 = vmov %v3834_v43  ;;  %v645_v34 = vsel %vm2882_vm5, %v3354_v9, %v644_v41  ;;  %v649_v13 = vor.u32 %v648_v18, %v644_v41  ;;  %v3840_v41 = vld [vmem:[#allocation8_spill] sm:$0xff] }
  0xa0   : > { %v3494_v3 = vsel %vm2774_vm2, %v2302_v40, %v3835_v8  ;;  %v1117_v29 = vrot.slane %v3836_v57, 4  ;;  %v3837_v23 = vrot.slane %v3124_v30, 5  ;;  %v3511_v40 = vpop.permute.xlu0 %1358  ;;  %v3838_v19 = vmov %v3836_v57 }
  0xa1   : > { %v3519_v45 = vsel %vm2774_vm2, %v2303_v7, %v3838_v19  ;;  %v3839_v9 = vrot.slane %v3210_v37, 5  ;;  %v650_v4 = vrot.slane %v649_v13, 4  ;;  %v3841_v2 = vrot.slane %v3262_v48, 5  ;;  %v3842_v7 = vld [vmem:[#allocation9_spill] sm:$0xff] }
  0xa2   : > { %v3508_v35 = vsel %vm2774_vm2, %v1110_v53, %v3837_v23  ;;  %v2304_v53 = vrot.slane %v2296_v21, 9  ;;  %v1588_v37 = vsel %vm1509_vm7, %v1571_v1, %v3385_v17  ;;  %v666_v57 = vshll.u32 %v3842_v7, 16 }
  0xa3   : > { %v2374_v27 = vcombine.low %v3494_v3, %v3508_v35  ;;  %v3525_v30 = vsel %vm2774_vm2, %v1117_v29, %v3839_v9  ;;  %v1124_v8 = vrot.slane %v3841_v2, 4  ;;  %v670_v29 = vshrl.u32 %v3842_v7, 16 }
  0xa4   : > { %v2375_v43 = vcombine.low %v3519_v45, %v3525_v30  ;;  %v2305_v23 = vrot.slane %v2297_v5, 9  ;;  %v655_v13 = vsel %vm2882_vm5, %v650_v4, %v654_v39  ;;  %v3843_v9 = vmov %v3841_v2  ;;  %v2298_v5 = vld [vmem:[%s2719_s24 + $0x60] sm:$0xe] }
  0xa5   : > { %v3543_v21 = vsel %vm2774_vm2, %v2304_v53, %v3843_v9  ;;  %v3844_v2 = vrot.slane %v3286_v56, 5  ;;  %v1131_v1 = vrot.slane %v1129_v60, 4  ;;  %v3554_v7 = vcombine.low %v645_v34, %v655_v13  ;;  %v2299_v9 = vld [vmem:[%s2719_s24 + $0x6c] sm:$0xe] }
  0xa6   : > { %v1217_v19 = vpop.permute.xlu1 %1216  ;;  %v668_v48 = vrot.slane %v666_v57, 5  ;;  %v3845_v4 = vshll.u32 %v3242_v0, 16  ;;  %v3569_v34 = vsel %vm2774_vm2, %v2305_v23, %v1129_v60  ;;  %v2307_v13 = vrot.slane %v2299_v9, 9 }
  0xa7   : > { %v3549_v17 = vsel %vm2774_vm2, %v1124_v8, %v3844_v2  ;;  %v1505_v56 = vsel %vm1484_vm6, %v2314_v55, %v1217_v19  ;;  %v672_v8 = vrot.slane %v670_v29, 4  ;;  %v3575_v57 = vsel %vm2774_vm2, %v1131_v1, %v1132_v42  ;;  %v3848_v19 = vld [vmem:[#allocation3_spill] sm:$0xff] }
  0xa8   : > { %v2376_v39 = vcombine.low %v3543_v21, %v3549_v17  ;;  %v678_v53 = vrot.slane %v3845_v4, 5  ;;  %v669_v11 = vsel %vm2882_vm5, %v3387_v28, %v668_v48  ;;  %v2377_v22 = vcombine.low %v3569_v34, %v3575_v57  ;;  %v3849_v28 = vld [vmem:[#allocation5_spill] sm:$0xff] }
  0xa9   : > { %v1205_v0 = vpop.permute.xlu0 %1204  ;;  %v2306_v55 = vrot.slane %v2298_v5, 9  ;;  %v3847_v29 = vrot.slane %v3846_v31, 5  ;;  %v673_v23 = vor.u32 %v672_v8, %v668_v48  ;;  %v3850_v2 = vrot.slane %v3849_v28, 5  ;;  %v3851_v31 = vld [vmem:[#allocation2_spill] sm:$0xff] }
  0xaa   : > { %v1487_v32 = vsel %vm1484_vm6, %v2308_v10, %v1205_v0  ;;  %v1457_v42 = vpop.permute.xlu1 %1456  ;;  %v3852_v18 = vrot.slane %v3851_v31, 5  ;;  %v2313_v63 = vcombine.low %v3853_v26, %v3299_v51  ;;  %v1576_v10 = vsel %vm1509_vm7, %v3444_v44, %v3370_v36  ;;  %v3855_v0 = vld [vmem:[#allocation6_spill] sm:$0xff] }
  0xab   : > { %v3587_v60 = vsel %vm2774_vm2, %v3848_v19, %v3847_v29  ;;  %v1145_v1 = vrot.slane %v3850_v2, 4  ;;  %v1610_v5 = vsel %vm1526_vm8, %v1588_v37, %v1457_v42  ;;  %v1511_v4 = vsel %vm1509_vm7, %v1487_v32, %v3429_v24 }
  0xac   : > { %v3602_v29 = vsel %vm2774_vm2, %v2306_v55, %v3852_v18  ;;  %1863 = vmatprep.mubr.bf16.mxu1 %v1610_v5  ;;  %v674_v48 = vrot.slane %v673_v23, 4  ;;  %v3854_v24 = vmov %v3850_v2  ;;  %v1523_v8 = vsel %vm1509_vm7, %v1505_v56, %v3482_v58  ;;  %v2601_v58 = vld [vmem:[%s3794_s1 + $0x88] sm:$0xff]  }
  0xad   : > { %v2378_v37 = vcombine.low %v3602_v29, %v3587_v60  ;;  %v3615_v9 = vsel %vm2774_vm2, %v2307_v13, %v3854_v24  ;;  %v1445_v18 = vpop.permute.xlu0 %1444  ;;  %v3856_v55 = vrot.slane %v3855_v0, 5  ;;  %v690_v36 = vshll.u32 %v3309_v20, 16  ;;  %v2612_v0 = vld [vmem:[%s2719_s24 + $0x10] sm:$0xf] }
  0xae   : > { %v694_v44 = vshrl.u32 %v3309_v20, 16  ;;  %v1592_v32 = vsel %vm1526_vm8, %v1576_v10, %v1445_v18  ;;  %v1305_v42 = vpop.permute.xlu1 %1304  ;;  %v1528_v23 = vsel %vm1526_vm8, %v1511_v4, %v3396_v59  ;;  %v679_v56 = vsel %vm2882_vm5, %v674_v48, %v678_v53  ;;  %v3857_v59 = vld [vmem:[#allocation7_spill] sm:$0xff] }
  0xaf   : > { %v3623_v19 = vsel %vm2774_vm2, %v1145_v1, %v3856_v55  ;;  %1815 = vmatprep.mubr.bf16.mxu0 %v1592_v32  ;;  %v1546_v13 = vsel %vm1526_vm8, %v1523_v8, %v1305_v42  ;;  %v3638_v20 = vcombine.low %v669_v11, %v679_v56  ;;  %v692_v28 = vrot.slane %v690_v36, 5  ;;  %v2611_v8 = vld [vmem:[%s2719_s24 + $0xc] sm:$0xf] }
  0xb0   : > { %v2379_v33 = vcombine.low %v3615_v9, %v3623_v19  ;;  %v696_v2 = vrot.slane %v694_v44, 4  ;;  %1816 = vmatmul.mubr.bf16.vlgmr.msra.gmra.mrb[0].mxu0 %v1528_v23  ;;  %1864 = vmatmul.mubr.bf16.vlgmr.msra.gmra.mrb[0].mxu1 %v1546_v13  ;;  %v3858_v5 = vshll.u32 %v3320_v38, 16  ;;  %v2309_v55 = vcombine.low %v2611_v8, %v2612_v0  ;;  %v2615_v0 = vld [vmem:[%s2719_s24 + $0x18] sm:$0xf] }
  0xb1   : > { %2484 = vmatpush3.bf16.msra.mxu1 %v3857_v59  ;;  %v693_v53 = vsel %vm2882_vm5, %v3415_v15, %v692_v28  ;;  %v1556_v38 = vsel %vm1484_vm6, %v3431_v61, %v3511_v40  ;;  %v2614_v61 = vld [vmem:[%s2719_s24 + $0x58] sm:$0xf]  ;;  %v3860_v57 = vcombine.low %v3840_v41, %v3225_v25 }
  0xb2   : > { %v697_v1 = vor.u32 %v696_v2, %v692_v28  ;;  %v702_v4 = vrot.slane %v3858_v5, 5  ;;  %2485 = vmatprep.subr.bf16.mxu1 %v2601_v58  ;;  %v1247_v24 = vpop.permute.xlu1 %1246  ;;  %v2613_v2 = vld [vmem:[%s2719_s24 + $0x54] sm:$0xf] }
  0xb3   : > { %v1207_v11 = vpop.permute.xlu0 %1206  ;;  %v2315_v40 = vcombine.low %v2613_v2, %v2614_v61 }
  0xb4   : > { %v698_v31 = vrot.slane %v697_v1, 4  ;;  %v1490_v36 = vsel %vm1484_vm6, %v2309_v55, %v1207_v11  ;;  %v2616_v55 = vld [vmem:[%s2719_s24 + $0x1c] sm:$0xf]  ;;  %s2207_s24 = sshll.u32 %s2639_s12, 3  ;;  %s3876_s12 = smov (!%p211_p7, %s2639_s12), 1 }
  0xb5   : > { %2486 = vmatpush3.bf16.msra.mxu1 %v2601_v58  ;;  %v1513_v32 = vsel %vm1509_vm7, %v1490_v36, %v1247_v24  ;;  %p201_p6 = scmp.lt.s32.totalorder %s2207_s24, 15  ;;  %s214_s9 = sadd.s32 %s2211_s8, %s3876_s12 }
  0xb6   : > { %v703_v10 = vsel %vm2882_vm5, %v698_v31, %v702_v4  ;;  %v1295_v15 = vpop.permute.xlu1 %1294  ;;  %s2212_s10 = sshll.u32 %s214_s9, 1 }
  0xb7   : > { %v3648_v48 = vcombine.low %v693_v53, %v703_v10  ;;  %v1407_v18 = vpop.permute.xlu0 %1406  ;;  %v1531_v23 = vsel %vm1526_vm8, %v1513_v32, %v1295_v15  ;;  %s3874_s24 = smov (!%p201_p6, %s2207_s24), 15  ;;  %s216_s21 = scalar_lea.vmem %s3796_s3, %s2212_s10 }
  0xb8   : > { %v1578_v44 = vsel %vm1509_vm7, %v1556_v38, %v1407_v18  ;;  %v2310_v38 = vcombine.low %v2615_v0, %v2616_v55  ;;  %s2208_s19 = sshll.u32 %s3874_s24, 1 }
  0xb9   : > { %s205_s29 = sadd.s32 %s2209_s28, %s2208_s19 }
  0xba   : > { %s2210_s4 = sshll.u32 %s205_s29, 3 }
  0xbb   : > { %s3751_s7 = scalar_lea.vmem %s3795_s2, %s2210_s4 }
  0xbd   : > { %v1447_v62 = vpop.permute.xlu0 %1446 }
  0xbe   : > { %v1595_v42 = vsel %vm1526_vm8, %v1578_v44, %v1447_v62 }
  0xbf   : > { %1823 = vmatprep.mubr.bf16.mxu0 %v1595_v42 }
  0xc0   : > { %1824 = vmatmul.mubr.bf16.gmra.mrb[4].mxu0 %v1531_v23 }
  0xc1   : > { %v1371_v58 = vpop.permute.xlu0 %1370 }
  0xc2   : > { %v1219_v56 = vpop.permute.xlu1 %1218  ;;  %v1574_v59 = vsel %vm1484_vm6, %v3480_v12, %v1371_v58 }
  0xc3   : > { %v1508_v5 = vsel %vm1484_vm6, %v2315_v40, %v1219_v56 }
  0xc5   : > { %v1419_v13 = vpop.permute.xlu0 %1418 }
  0xc6   : > { %v1259_v28 = vpop.permute.xlu1 %1258  ;;  %v1590_v53 = vsel %vm1509_vm7, %v1574_v59, %v1419_v13 }
  0xc7   : > { %v1525_v11 = vsel %vm1509_vm7, %v1508_v5, %v1259_v28 }
  0xc9   : > { %v1361_v4 = vpop.permute.xlu0 %1360 }
  0xca   : > { %v1459_v1 = vpop.permute.xlu1 %1458  ;;  %v1559_v54 = vsel %vm1484_vm6, %v3499_v14, %v1361_v4 }
  0xcb   : > { %v1613_v31 = vsel %vm1526_vm8, %v1590_v53, %v1459_v1 }
  0xcc   : > { %1871 = vmatprep.mubr.bf16.mxu1 %v1613_v31 }
  0xce   : > { %v1307_v10 = vpop.permute.xlu1 %1306 }
  0xcf   : > { %v1549_v24 = vsel %vm1526_vm8, %v1525_v11, %v1307_v10 }
  0xd0   : > { %1872 = vmatmul.mubr.bf16.gmra.mrb[4].mxu1 %v1549_v24 }
  0xd1   : > { %v1209_v18 = vpop.permute.xlu0 %1208  ;;  %2487 = vmatprep.mubr.msk.bf16.mxu1 %vm1484_vm6, %v2372_v47 }
  0xd2   : > { %v1249_v12 = vpop.permute.xlu1 %1248  ;;  %v1493_v16 = vsel %vm1484_vm6, %v2310_v38, %v1209_v18 }
  0xd3   : > { %v1515_v44 = vsel %vm1509_vm7, %v1493_v16, %v1249_v12 }
  0xd5   : > { %v1409_v8 = vpop.permute.xlu0 %1408 }
  0xd6   : > { %v1297_v15 = vpop.permute.xlu1 %1296  ;;  %v1580_v47 = vsel %vm1509_vm7, %v1559_v54, %v1409_v8 }
  0xd7   : > { %v1534_v50 = vsel %vm1526_vm8, %v1515_v44, %v1297_v15 }
  0xd8   : > { %2488 = vmatmul.mubr.msk.bf16.vlgmr.msra.gmra.mrb[8].mxu1 %vm1484_vm6, %v2373_v6 }
  0xd9   : > { %2491 = vmatprep.mubr.msk.bf16.mxu1 %vm1484_vm6, %v2374_v27  ;;  %v3859_v27 = vcombine.low %v3128_v49, %v3140_v46 }
  0xda   : > { %v1449_v36 = vpop.permute.xlu0 %1448 }
  0xdb   : > { %v1598_v62 = vsel %vm1526_vm8, %v1580_v47, %v1449_v36 }
  0xdc   : > { %1831 = vmatprep.mubr.bf16.mxu0 %v1598_v62 }
  0xdd   : > { %v1211_v52 = vpop.permute.xlu1 %1210  ;;  %1832 = vmatmul.mubr.bf16.gmra.mrb[8].mxu0 %v1534_v50 }
  0xde   : > { %v1363_v6 = vpop.permute.xlu0 %1362  ;;  %v1496_v32 = vsel %vm1484_vm6, %v3859_v27, %v1211_v52 }
  0xdf   : > { %v1562_v42 = vsel %vm1484_vm6, %v3554_v7, %v1363_v6 }
  0xe0   : > { %2492 = vmatmul.mubr.msk.bf16.gmra.mrb[12].mxu1 %vm1484_vm6, %v2375_v43 }
  0xe1   : > { %2495 = vmatprep.mubr.msk.bf16.mxu1 %vm1484_vm6, %v2376_v39  ;;  %v1251_v3 = vpop.permute.xlu1 %1250 }
  0xe2   : > { %v1411_v14 = vpop.permute.xlu0 %1410  ;;  %v1517_v49 = vsel %vm1509_vm7, %v1496_v32, %v1251_v3 }
  0xe3   : > { %v1582_v45 = vsel %vm1509_vm7, %v1562_v42, %v1411_v14 }
  0xe5   : > { %v1299_v35 = vpop.permute.xlu1 %1298 }
  0xe6   : > { %v1537_v43 = vsel %vm1526_vm8, %v1517_v49, %v1299_v35 }
  0xe7   : > { %v1451_v30 = vpop.permute.xlu0 %1450 }
  0xe8   : > { %2496 = vmatmul.mubr.msk.bf16.gmra.mrb[16].mxu1 %vm1484_vm6, %v2377_v22  ;;  %v1601_v46 = vsel %vm1526_vm8, %v1582_v45, %v1451_v30 }
  0xe9   : > { %2499 = vmatprep.mubr.msk.bf16.mxu1 %vm1484_vm6, %v2378_v37  ;;  %1839 = vmatprep.mubr.bf16.mxu0 %v1601_v46 }
  0xea   : > { %v1213_v21 = vpop.permute.xlu1 %1212  ;;  %1840 = vmatmul.mubr.bf16.gmra.mrb[12].mxu0 %v1537_v43 }
  0xeb   : > { %v1365_v17 = vpop.permute.xlu0 %1364  ;;  %v1499_v22 = vsel %vm1484_vm6, %v3860_v57, %v1213_v21 }
  0xec   : > { %v1565_v60 = vsel %vm1484_vm6, %v3638_v20, %v1365_v17 }
  0xee   : > { %v1253_v7 = vpop.permute.xlu1 %1252 }
  0xef   : > { %v1413_v39 = vpop.permute.xlu0 %1412  ;;  %v1519_v23 = vsel %vm1509_vm7, %v1499_v22, %v1253_v7 }
  0xf0   : > { %2500 = vmatmul.mubr.msk.bf16.gmra.mrb[20].mxu1 %vm1484_vm6, %v2379_v33  ;;  %v1584_v29 = vsel %vm1509_vm7, %v1565_v60, %v1413_v39 }
  0xf2   : > { %v1301_v34 = vpop.permute.xlu1 %1300 }
  0xf3   : > { %v1540_v9 = vsel %vm1526_vm8, %v1519_v23, %v1301_v34 }
  0xf5   : > { %v1453_v37 = vpop.permute.xlu0 %1452 }
  0xf6   : > { %v1604_v58 = vsel %vm1526_vm8, %v1584_v29, %v1453_v37 }
  0xf7   : > { %1847 = vmatprep.mubr.bf16.mxu0 %v1604_v58 }
  0xf8   : > { %1848 = vmatmul.mubr.bf16.gmra.mrb[16].mxu0 %v1540_v9 }
  0xf9   : > { %v1215_v19 = vpop.permute.xlu1 %1214  ;;  %v1367_v33 = vpop.permute.xlu0 %1366 }
  0xfa   : > { %v1502_v41 = vsel %vm1484_vm6, %v2313_v63, %v1215_v19  ;;  %v1568_v20 = vsel %vm1484_vm6, %v3648_v48, %v1367_v33 }
  0xfd   : > { %v1255_v56 = vpop.permute.xlu1 %1254  ;;  %v1415_v25 = vpop.permute.xlu0 %1414 }
  0xfe   : > { %v1586_v28 = vsel %vm1509_vm7, %v1568_v20, %v1415_v25  ;;  %v1521_v61 = vsel %vm1509_vm7, %v1502_v41, %v1255_v56 }
 0x101   : > { %v1303_v13 = vpop.permute.xlu1 %1302 }
 0x102   : > { %v1543_v59 = vsel %vm1526_vm8, %v1521_v61, %v1303_v13 }
 0x104   : > { %v1455_v2 = vpop.permute.xlu0 %1454 }
 0x105   : > { %v1607_v40 = vsel %vm1526_vm8, %v1586_v28, %v1455_v2 }
 0x106   : > { %1855 = vmatprep.mubr.bf16.mxu0 %v1607_v40 }
 0x107   : > { %1856 = vmatmul.mubr.bf16.gmra.mrb[20].mxu0 %v1543_v59 }
 0x183   : > { %v2425_v53 = vpop.f32.mrb[0].mxu0  ;;  %v2461_v1 = vpop.f32.mrb[0].mxu1 }
 0x184   : > { %v2426_v51 = vpop.f32.mrb[1].mxu0  ;;  %v2462_v26 = vpop.f32.mrb[1].mxu1 }
 0x185   : > { %v2427_v63 = vadd.f32 %v2426_v51, %v2425_v53  ;;  %v2428_v5 = vpop.f32.mrb[2].mxu0  ;;  %v3740_v48 = vadd.f32 %v2462_v26, %v2461_v1  ;;  %v2464_v4 = vpop.f32.mrb[2].mxu1 }
 0x186   : > { %v2429_v31 = vpop.f32.mrb[3].mxu0  ;;  %v2465_v11 = vpop.f32.mrb[3].mxu1 }
 0x187   : > { %v2430_v10 = vadd.f32 %v2429_v31, %v2428_v5  ;;  %v3742_v24 = vadd.f32 %v2465_v11, %v2464_v4 }
 0x193   : > { %v2431_v18 = vpop.f32.mrb[4].mxu0 }
 0x194   : > { %v2432_v12 = vpop.f32.mrb[5].mxu0 }
 0x195   : > { %v2433_v8 = vadd.f32 %v2432_v12, %v2431_v18  ;;  %v2434_v0 = vpop.f32.mrb[6].mxu0 }
 0x196   : > { %v2435_v55 = vpop.f32.mrb[7].mxu0 }
 0x197   : > { %v2436_v38 = vadd.f32 %v2435_v55, %v2434_v0 }
 0x1a3   : > { %v2467_v15 = vpop.f32.mrb[4].mxu1 }
 0x1a4   : > { %v2468_v54 = vpop.f32.mrb[5].mxu1 }
 0x1a5   : > { %v2469_v16 = vadd.f32 %v2468_v54, %v2467_v15  ;;  %v2470_v47 = vpop.f32.mrb[6].mxu1 }
 0x1a6   : > { %v2471_v36 = vpop.f32.mrb[7].mxu1 }
 0x1a7   : > { %v3746_v44 = vadd.f32 %v2471_v36, %v2470_v47 }
 0x1ab   : > { %v2489_v62 = vpop.f32.mrb[8].mxu1 }
 0x1ac   : > { %v1923_v50 = vadd.f32 %v2489_v62, %v2433_v8  ;;  %v1914_v52 = vpop.f32.mrb[9].mxu1 }
 0x1ad   : > { %v1915_v6 = vadd.f32 %v2427_v63, %v1914_v52  ;;  %v2490_v3 = vpop.f32.mrb[10].mxu1 }
 0x1ae   : > { %1979 = vst [vmem:[%s3751_s7 + $0x10] sm:$0xff] %v1923_v50  ;;  %v1926_v14 = vadd.f32 %v2490_v3, %v2436_v38  ;;  %v1917_v35 = vpop.f32.mrb[11].mxu1  ;;  %v2016_v46 = vmul.f32 %v1923_v50, %v1923_v50 }
 0x1af   : > { %1977 = vst [vmem:[%s3751_s7] sm:$0xff] %v1915_v6  ;;  %v1918_v27 = vadd.f32 %v2430_v10, %v1917_v35  ;;  %v2014_v32 = vmul.f32 %v1915_v6, %v1915_v6 }
 0x1b0   : > { %1980 = vst [vmem:[%s3751_s7 + $0x18] sm:$0xff] %v1926_v14  ;;  %v2437_v42 = vpop.f32.mrb[8].mxu0  ;;  %v2017_v34 = vmul.f32 %v1926_v14, %v1926_v14 }
 0x1b1   : > { %1978 = vst [vmem:[%s3751_s7 + $0x8] sm:$0xff] %v1918_v27  ;;  %v1993_v45 = vadd.f32 %v1918_v27, %v1915_v6  ;;  %v2015_v30 = vmul.f32 %v1918_v27, %v1918_v27  ;;  %v2438_v49 = vpop.f32.mrb[9].mxu0 }
 0x1b2   : > { %v2439_v43 = vadd.f32 %v2438_v49, %v2437_v42  ;;  %v2440_v7 = vpop.f32.mrb[10].mxu0 }
 0x1b3   : > { %v1994_v21 = vadd.f32 %v1993_v45, %v1923_v50  ;;  %v2030_v17 = vadd.f32 %v2015_v30, %v2014_v32  ;;  %v2493_v39 = vpop.f32.mrb[12].mxu1  ;;  %v2441_v57 = vpop.f32.mrb[11].mxu0 }
 0x1b4   : > { %v1930_v22 = vpop.f32.mrb[13].mxu1  ;;  %v2442_v29 = vadd.f32 %v2441_v57, %v2440_v7 }
 0x1b5   : > { %v2031_v60 = vadd.f32 %v2030_v17, %v2016_v46  ;;  %v1931_v37 = vadd.f32 %v2439_v43, %v1930_v22  ;;  %v1995_v23 = vadd.f32 %v1994_v21, %v1926_v14  ;;  %v2494_v58 = vpop.f32.mrb[14].mxu1 }
 0x1b6   : > { %v1933_v9 = vpop.f32.mrb[15].mxu1 }
 0x1b7   : > { %1981 = vst [vmem:[%s3751_s7 + $0x20] sm:$0xff] %v1931_v37  ;;  %v1996_v19 = vadd.f32 %v1995_v23, %v1931_v37  ;;  %v2018_v33 = vmul.f32 %v1931_v37, %v1931_v37  ;;  %v2032_v56 = vadd.f32 %v2031_v60, %v2017_v34  ;;  %v1934_v25 = vadd.f32 %v2442_v29, %v1933_v9 }
 0x1b9   : > { %v2033_v41 = vadd.f32 %v2032_v56, %v2018_v33  ;;  %1982 = vst [vmem:[%s3751_s7 + $0x28] sm:$0xff] %v1934_v25  ;;  %v1997_v20 = vadd.f32 %v1996_v19, %v1934_v25  ;;  %v2019_v13 = vmul.f32 %v1934_v25, %v1934_v25 }
 0x1bb   : > { %v2034_v28 = vadd.f32 %v2033_v41, %v2019_v13  ;;  %v2497_v2 = vpop.f32.mrb[16].mxu1 }
 0x1bc   : > { %v1946_v61 = vpop.f32.mrb[17].mxu1 }
 0x1bd   : > { %v2498_v40 = vpop.f32.mrb[18].mxu1  ;;  %v2443_v53 = vpop.f32.mrb[12].mxu0 }
 0x1be   : > { %v1949_v59 = vpop.f32.mrb[19].mxu1  ;;  %v2444_v1 = vpop.f32.mrb[13].mxu0 }
 0x1bf   : > { %v2445_v51 = vadd.f32 %v2444_v1, %v2443_v53  ;;  %v2446_v26 = vpop.f32.mrb[14].mxu0 }
 0x1c0   : > { %v2447_v63 = vpop.f32.mrb[15].mxu0 }
 0x1c1   : > { %v1939_v5 = vadd.f32 %v2493_v39, %v2445_v51  ;;  %v2448_v4 = vadd.f32 %v2447_v63, %v2446_v26 }
 0x1c3   : > { %v2501_v31 = vpop.f32.mrb[20].mxu1  ;;  %1983 = vst [vmem:[%s3751_s7 + $0x30] sm:$0xff] %v1939_v5  ;;  %v1998_v18 = vadd.f32 %v1997_v20, %v1939_v5  ;;  %v2020_v12 = vmul.f32 %v1939_v5, %v1939_v5  ;;  %v1942_v8 = vadd.f32 %v2494_v58, %v2448_v4 }
 0x1c4   : > { %v1971_v11 = vadd.f32 %v2501_v31, %v2469_v16  ;;  %v1962_v10 = vpop.f32.mrb[21].mxu1 }
 0x1c5   : > { %v1963_v0 = vadd.f32 %v3740_v48, %v1962_v10  ;;  %v2502_v55 = vpop.f32.mrb[22].mxu1  ;;  %v2035_v54 = vadd.f32 %v2034_v28, %v2020_v12  ;;  %1984 = vst [vmem:[%s3751_s7 + $0x38] sm:$0xff] %v1942_v8  ;;  %v1999_v47 = vadd.f32 %v1998_v18, %v1942_v8  ;;  %v2021_v36 = vmul.f32 %v1942_v8, %v1942_v8 }
 0x1c6   : > { %1991 = vst [vmem:[%s3751_s7 + $0x70] sm:$0xff] %v1971_v11  ;;  %v1974_v38 = vadd.f32 %v2502_v55, %v3746_v44  ;;  %v1965_v15 = vpop.f32.mrb[23].mxu1  ;;  %v2028_v25 = vmul.f32 %v1971_v11, %v1971_v11 }
 0x1c7   : > { %1989 = vst [vmem:[%s3751_s7 + $0x60] sm:$0xff] %v1963_v0  ;;  %v1966_v16 = vadd.f32 %v3742_v24, %v1965_v15  ;;  %v2036_v62 = vadd.f32 %v2035_v54, %v2021_v36  ;;  %v2026_v23 = vmul.f32 %v1963_v0, %v1963_v0 }
 0x1c8   : > { %1992 = vst [vmem:[%s3751_s7 + $0x78] sm:$0xff] %v1974_v38  ;;  %v2029_v13 = vmul.f32 %v1974_v38, %v1974_v38 }
 0x1c9   : > { %1990 = vst [vmem:[%s3751_s7 + $0x68] sm:$0xff] %v1966_v16  ;;  %v2027_v19 = vmul.f32 %v1966_v16, %v1966_v16 }
 0x1cb   : > { %v2449_v50 = vpop.f32.mrb[16].mxu0 }
 0x1cc   : > { %v2450_v52 = vpop.f32.mrb[17].mxu0 }
 0x1cd   : > { %v2451_v48 = vadd.f32 %v2450_v52, %v2449_v50  ;;  %v2452_v6 = vpop.f32.mrb[18].mxu0 }
 0x1ce   : > { %v2453_v3 = vpop.f32.mrb[19].mxu0 }
 0x1cf   : > { %v1947_v14 = vadd.f32 %v2451_v48, %v1946_v61  ;;  %v2454_v44 = vadd.f32 %v2453_v3, %v2452_v6 }
 0x1d1   : > { %1985 = vst [vmem:[%s3751_s7 + $0x40] sm:$0xff] %v1947_v14  ;;  %v2000_v35 = vadd.f32 %v1999_v47, %v1947_v14  ;;  %v2022_v27 = vmul.f32 %v1947_v14, %v1947_v14  ;;  %v1950_v32 = vadd.f32 %v2454_v44, %v1949_v59 }
 0x1d3   : > { %v2037_v42 = vadd.f32 %v2036_v62, %v2022_v27  ;;  %1986 = vst [vmem:[%s3751_s7 + $0x48] sm:$0xff] %v1950_v32  ;;  %v2001_v45 = vadd.f32 %v2000_v35, %v1950_v32  ;;  %v2023_v30 = vmul.f32 %v1950_v32, %v1950_v32 }
 0x1d5   : > { %v2038_v24 = vadd.f32 %v2037_v42, %v2023_v30 }
 0x1da   : > { %v2455_v49 = vpop.f32.mrb[20].mxu0 }
 0x1db   : > { %v2456_v46 = vpop.f32.mrb[21].mxu0 }
 0x1dc   : > { %v2457_v43 = vadd.f32 %v2456_v46, %v2455_v49  ;;  %v2458_v21 = vpop.f32.mrb[22].mxu0 }
 0x1dd   : > { %v2459_v17 = vpop.f32.mrb[23].mxu0 }
 0x1de   : > { %v1955_v7 = vadd.f32 %v2497_v2, %v2457_v43  ;;  %v2460_v39 = vadd.f32 %v2459_v17, %v2458_v21 }
 0x1e0   : > { %1987 = vst [vmem:[%s3751_s7 + $0x50] sm:$0xff] %v1955_v7  ;;  %v2002_v34 = vadd.f32 %v2001_v45, %v1955_v7  ;;  %v2024_v57 = vmul.f32 %v1955_v7, %v1955_v7  ;;  %v1958_v22 = vadd.f32 %v2498_v40, %v2460_v39 }
 0x1e2   : > { %v2039_v60 = vadd.f32 %v2038_v24, %v2024_v57  ;;  %1988 = vst [vmem:[%s3751_s7 + $0x58] sm:$0xff] %v1958_v22  ;;  %v2003_v29 = vadd.f32 %v2002_v34, %v1958_v22  ;;  %v2025_v37 = vmul.f32 %v1958_v22, %v1958_v22 }
 0x1e4   : > { %v2004_v58 = vadd.f32 %v2003_v29, %v1963_v0  ;;  %v2040_v9 = vadd.f32 %v2039_v60, %v2025_v37 }
 0x1e6   : > { %v2005_v33 = vadd.f32 %v2004_v58, %v1966_v16  ;;  %v2041_v56 = vadd.f32 %v2040_v9, %v2026_v23 }
 0x1e8   : > { %v2006_v41 = vadd.f32 %v2005_v33, %v1971_v11  ;;  %v2042_v20 = vadd.f32 %v2041_v56, %v2027_v19 }
 0x1ea   : > { %v2007_v28 = vadd.f32 %v2006_v41, %v1974_v38  ;;  %v2043_v2 = vadd.f32 %v2042_v20, %v2028_v25 }
 0x1ec   : > { %v2008_v61 = vrot.slane %v2007_v28, 4  ;;  %v2044_v40 = vadd.f32 %v2043_v2, %v2029_v13 }
 0x1ee   : > { %v2009_v59 = vadd.f32 %v2008_v61, %v2007_v28  ;;  %v2045_v53 = vrot.slane %v2044_v40, 4 }
 0x1f0   : > { %v2010_v1 = vrot.slane %v2009_v59, 2  ;;  %v2046_v51 = vadd.f32 %v2045_v53, %v2044_v40 }
 0x1f2   : > { %v2011_v26 = vadd.f32 %v2010_v1, %v2009_v59  ;;  %v2047_v63 = vrot.slane %v2046_v51, 2 }
 0x1f4   : > { %v2012_v5 = vrot.slane %v2011_v26, 1  ;;  %v2048_v4 = vadd.f32 %v2047_v63, %v2046_v51 }
 0x1f6   : > { %v2049_v31 = vrot.slane %v2048_v4, 1  ;;  %v2013_v11 = vadd.f32 %v2012_v5, %v2011_v26 }
 0x1f8   : > { %v2050_v10 = vadd.f32 %v2049_v31, %v2048_v4 }
 0x1fa   : > { %v2052_v18 = vsel %vm2051_vm9, %v2013_v11, %v2050_v10 }
 0x1fb   : > { %2053 = vst [vmem:[%s216_s21] sm:$0x3] %v2052_v18 }
 0x1fc PF: > { %s14_s16 = sadd.s32 1, %s2655_s16   ;;  %s3861_s12 = smov %s2647_s14 }
 0x1fd   : > { %p11_p8 = scmp.ge.s32.totalorder %s14_s16, 6   ;;  %s3862_s13 = smov %s2651_s15 }
 0x1fe   : > { %s3863_s14 = smov %s3866_s17  ;;  %s3864_s15 = smov %s3870_s18 }
 0x1ff   :  { %13 = sbr.rel (!%p11_p8) target bundleno = 3 (0x3), region = 73 }

</bundles_post_ra>
